<compile_context>
chip_gen: v7x
topology: tpu7x:2x2x1
jax: 0.10.0
libtpu: 0.0.40
codegen_flags: <defaults>
</compile_context>

<pallas_src>
import functools
import numpy as np
import jax
import jax.numpy as jnp
from jax.experimental import pallas as pl
from jax.experimental.pallas import tpu as pltpu

BIN_SIZES = (1, 2, 3, 6)
NBINS = len(BIN_SIZES)
_SUM_B2 = sum(b * b for b in BIN_SIZES)            # 50 pooled values per channel


# ----------------------------------------------------------------------------
# Fixed (non-learned) 1-D operators: adaptive avg-pool and bilinear upsample
# ----------------------------------------------------------------------------
def adaptive_pool_matrix(out_size: int, in_size: int) -> np.ndarray:
    """P[i, k]: nn.AdaptiveAvgPool1d averaging weights."""
    P = np.zeros((out_size, in_size), dtype=np.float64)
    for i in range(out_size):
        start = (i * in_size) // out_size
        end = -(-((i + 1) * in_size) // out_size)  # ceil
        P[i, start:end] = 1.0 / (end - start)
    return P


def bilinear_upsample_matrix(out_size: int, in_size: int) -> np.ndarray:
    """U[o, i]: F.interpolate(mode='bilinear', align_corners=False) 1-D weights."""
    U = np.zeros((out_size, in_size), dtype=np.float64)
    scale = in_size / out_size
    for o in range(out_size):
        src = max((o + 0.5) * scale - 0.5, 0.0)
        i0 = min(int(np.floor(src)), in_size - 1)
        i1 = min(i0 + 1, in_size - 1)
        frac = src - i0
        U[o, i0] += 1.0 - frac
        U[o, i1] += frac
    return U


def _hi_lo_bf16(m32: np.ndarray):
    """Split an f32 matrix into (hi, lo) bf16 so hi + lo ~= m32 to ~2^-18 rel."""
    hi = m32.astype(jnp.bfloat16)
    lo = (m32 - hi.astype(np.float32)).astype(jnp.bfloat16)
    return hi, lo


@functools.lru_cache(maxsize=8)
def _factorized_operators(H: int, W: int):
    """K^T: (HW, S2P) pooling operator; G: (S2P, NBINS*HW) block-diag upsample."""
    HW = H * W
    S2P = -(-_SUM_B2 // 8) * 8                     # pad rank axis to sublane mult.
    K = np.zeros((S2P, HW), dtype=np.float64)
    G = np.zeros((S2P, NBINS * HW), dtype=np.float64)
    row = 0
    for s, b in enumerate(BIN_SIZES):
        Ph = adaptive_pool_matrix(b, H)
        Pw = adaptive_pool_matrix(b, W)
        Uh = bilinear_upsample_matrix(H, b)
        Uw = bilinear_upsample_matrix(W, b)
        K[row:row + b * b, :] = np.kron(Ph, Pw)                 # (b^2, HW)
        G[row:row + b * b, s * HW:(s + 1) * HW] = np.kron(Uh, Uw).T
        row += b * b
    kt32 = np.ascontiguousarray(K.T).astype(np.float32)        # (HW, S2P)
    g32 = G.astype(np.float32)                                  # (S2P, NBINS*HW)
    kt_hi, kt_lo = _hi_lo_bf16(kt32)
    g_hi, g_lo = _hi_lo_bf16(g32)
    return kt_hi, kt_lo, g_hi, g_lo, S2P


# ----------------------------------------------------------------------------
# Generation-aware VMEM budgeting and channel-tile selection
# ----------------------------------------------------------------------------
def _vmem_capacity_bytes() -> int:
    try:
        return int(pltpu.get_tpu_info().vmem_capacity_bytes)
    except Exception:
        return 64 << 20            # conservative default (v7x per-core VMEM)


def _vmem_budget_bytes() -> int:
    cap = _vmem_capacity_bytes()
    # ~40 MiB scoped cap on 64 MiB parts (v7x); up to ~96 MiB on 128 MiB parts.
    return (40 << 20) if cap <= (64 << 20) else (96 << 20)


def _pick_channel_tile(B, Cp, HW, in_bytes, out_bytes, block_budget):
    """Largest multiple-of-8 divisor of Cp (<=256) that fits and keeps >=2 steps."""
    cands = [t for t in range(min(Cp, 256), 7, -8) if Cp % t == 0] or [Cp]

    def blocks_bytes(t):   # double-buffered input + output blocks
        return 2 * (t * HW * in_bytes + (NBINS + 1) * t * HW * out_bytes)

    feasible = [t for t in cands if blocks_bytes(t) <= block_budget] or [cands[-1]]
    for t in feasible:                 # prefer >=2 grid steps (v7x: 2 TensorCores)
        if B * (Cp // t) >= 2:
            return t
    return feasible[0]


# ----------------------------------------------------------------------------
# Kernel
# ----------------------------------------------------------------------------
def _make_kernel(split_x: bool):
    def kernel(x_ref, kt_hi_ref, kt_lo_ref, g_hi_ref, g_lo_ref, o_ref):
        # x_ref : (1, TC, HW)          input dtype
        # kt_*  : (HW, S2P)  bf16      pooling operator (hi/lo split)
        # g_*   : (S2P, NBINS*HW) bf16 block-diagonal upsample operator
        # o_ref : (1, NBINS+1, TC, HW) input dtype
        x = x_ref[0]
        hw = x.shape[-1]
        o_ref[0, 0] = x                               # passthrough plane (exact)

        def matmul_hi_lo(a_hi, a_lo, b_hi_ref, b_lo_ref):
            # 3-pass (2-pass if a_lo is None) hi/lo bf16 product, f32 accumulate.
            b_hi = b_hi_ref[...]
            acc = jnp.dot(a_hi, b_hi, preferred_element_type=jnp.float32)
            acc = acc + jnp.dot(a_hi, b_lo_ref[...],
                                preferred_element_type=jnp.float32)
            if a_lo is not None:
                acc = acc + jnp.dot(a_lo, b_hi,
                                    preferred_element_type=jnp.float32)
            return acc

        if split_x:
            xf = x.astype(jnp.float32)
            x_hi = xf.astype(jnp.bfloat16)
            x_lo = (xf - x_hi.astype(jnp.float32)).astype(jnp.bfloat16)
        else:                                          # input already bf16
            x_hi, x_lo = x.astype(jnp.bfloat16), None

        pooled = matmul_hi_lo(x_hi, x_lo, kt_hi_ref, kt_lo_ref)   # (TC, S2P) f32
        p_hi = pooled.astype(jnp.bfloat16)
        p_lo = (pooled - p_hi.astype(jnp.float32)).astype(jnp.bfloat16)
        y = matmul_hi_lo(p_hi, p_lo, g_hi_ref, g_lo_ref)          # (TC, 4*HW) f32
        y = y.astype(o_ref.dtype)
        for s in range(NBINS):                                    # static unroll
            o_ref[0, s + 1] = y[:, s * hw:(s + 1) * hw]
    return kernel


def _pallas_forward(x2, consts, *, TC, S2P, single_buffer_consts, split_x):
    B, Cp, HW = x2.shape
    out_dtype = x2.dtype
    in_bytes = x2.dtype.itemsize
    out_bytes = out_dtype.itemsize
    kt_hi, kt_lo, g_hi, g_lo = consts

    def const_spec(shape):
        if single_buffer_consts:
            # Block index never changes -> a single buffer is enough.
            return pl.BlockSpec(shape, lambda b, c: (0, 0),
                                pipeline_mode=pl.Buffered(1))
        return pl.BlockSpec(shape, lambda b, c: (0, 0))

    const_bytes = sum(a.size * a.dtype.itemsize for a in consts)
    const_live = const_bytes * (1 if single_buffer_consts else 2)
    x_blk = TC * HW * in_bytes
    o_blk = (NBINS + 1) * TC * HW * out_bytes
    vmem_need = 2 * (x_blk + o_blk) + const_live + (2 << 20)
    vmem_limit = int(min(max(vmem_need, 32 << 20), _vmem_budget_bytes()))

    passes_pool = 3 if split_x else 2                 # MXU passes per dot
    flops = (2 * B * Cp * HW * S2P * passes_pool
             + 2 * B * Cp * S2P * NBINS * HW * 3)
    bytes_accessed = (B * Cp * HW * in_bytes
                      + B * (NBINS + 1) * Cp * HW * out_bytes
                      + const_bytes)

    return pl.pallas_call(
        _make_kernel(split_x),
        out_shape=jax.ShapeDtypeStruct((B, NBINS + 1, Cp, HW), out_dtype),
        grid=(B, Cp // TC),
        in_specs=[
            pl.BlockSpec((1, TC, HW), lambda b, c: (b, c, 0)),
            const_spec((HW, S2P)),
            const_spec((HW, S2P)),
            const_spec((S2P, NBINS * HW)),
            const_spec((S2P, NBINS * HW)),
        ],
        out_specs=pl.BlockSpec((1, NBINS + 1, TC, HW),
                               lambda b, c: (b, 0, c, 0)),
        compiler_params=pltpu.CompilerParams(
            dimension_semantics=("parallel", "parallel"),
            vmem_limit_bytes=vmem_limit),
        cost_estimate=pl.CostEstimate(flops=int(flops), transcendentals=0,
                                      bytes_accessed=int(bytes_accessed)),
    )(x2, kt_hi, kt_lo, g_hi, g_lo)


# ----------------------------------------------------------------------------
# Public wrapper
# ----------------------------------------------------------------------------
def pyramid_pooling(x: jax.Array) -> jax.Array:
    """x: (B, C, H, W) NCHW (as the PyTorch module). Returns (B, 5*C, H, W), x.dtype."""
    B, C, H, W = x.shape
    HW = H * W
    kt_hi, kt_lo, g_hi, g_lo, S2P = _factorized_operators(H, W)
    consts = tuple(jnp.asarray(a) for a in (kt_hi, kt_lo, g_hi, g_lo))

    Cp = -(-C // 8) * 8                                # pad channels to sublane mult.
    x2 = x.reshape(B, C, HW)
    if Cp != C:
        x2 = jnp.pad(x2, ((0, 0), (0, Cp - C), (0, 0)))

    in_bytes = x.dtype.itemsize
    const_bytes = sum(a.size * a.dtype.itemsize for a in (kt_hi, kt_lo, g_hi, g_lo))
    block_budget = _vmem_budget_bytes() - const_bytes - (4 << 20)
    if block_budget < 2 * 8 * HW * (NBINS + 2) * in_bytes:
        # TODO(synk): tile the spatial axis of the upsample step for feature maps
        # this large (>~128x128); not needed for SAM2's pyramid-pooling inputs.
        raise NotImplementedError("spatial size too large for a single VMEM tile")
    TC = _pick_channel_tile(B, Cp, HW, in_bytes, in_bytes, block_budget)

    split_x = x.dtype != jnp.bfloat16                  # bf16 input: 2-pass dots
    try:
        out = _pallas_forward(x2, consts, TC=TC, S2P=S2P,
                              single_buffer_consts=True, split_x=split_x)
    except Exception:
        # Installed Pallas may not accept BlockSpec(pipeline_mode=pl.Buffered(1)).
        out = _pallas_forward(x2, consts, TC=TC, S2P=S2P,
                              single_buffer_consts=False, split_x=split_x)

    if Cp != C:
        out = out[:, :, :C]
    # (B, 5, C, HW) -> (B, 5*C, H, W): contiguous, metadata-only when C % 8 == 0.
    return out.reshape(B, (NBINS + 1) * C, H, W)


# ----------------------------------------------------------------------------
# Loop-based numpy reference (mirrors PyTorch adaptive pool + bilinear interp)
# ----------------------------------------------------------------------------
def _ref_adaptive_avg_pool(x, b):
    B, C, H, W = x.shape
    out = np.zeros((B, C, b, b), dtype=np.float32)
    for i in range(b):
        hs = (i * H) // b
        he = -(-((i + 1) * H) // b)
        for j in range(b):
            ws = (j * W) // b
            we = -(-((j + 1) * W) // b)
            out[:, :, i, j] = x[:, :, hs:he, ws:we].mean(axis=(2, 3))
    return out


def _ref_bilinear(x, H, W):
    B, C, h, w = x.shape
    out = np.zeros((B, C, H, W), dtype=np.float32)
    sh, sw = h / H, w / W
    for oy in range(H):
        sy = max((oy + 0.5) * sh - 0.5, 0.0)
        y0 = min(int(np.floor(sy)), h - 1)
        y1 = min(y0 + 1, h - 1)
        fy = sy - y0
        for ox in range(W):
            sx = max((ox + 0.5) * sw - 0.5, 0.0)
            x0 = min(int(np.floor(sx)), w - 1)
            x1 = min(x0 + 1, w - 1)
            fx = sx - x0
            out[:, :, oy, ox] = (
                (1 - fy) * (1 - fx) * x[:, :, y0, x0]
                + (1 - fy) * fx * x[:, :, y0, x1]
                + fy * (1 - fx) * x[:, :, y1, x0]
                + fy * fx * x[:, :, y1, x1])
    return out


def ref_pyramid_pooling(x_np):
    x_np = x_np.astype(np.float32)
    feats = [x_np]
    H, W = x_np.shape[2:]
    for b in BIN_SIZES:
        feats.append(_ref_bilinear(_ref_adaptive_avg_pool(x_np, b), H, W))
    return np.concatenate(feats, axis=1)


if __name__ == "__main__":
    # Case 1: module test shape; C=4 exercises the channel-padding path.
    B, C, H, W = 2, 4, 16, 16
    x = jax.random.normal(jax.random.PRNGKey(0), (B, C, H, W), dtype=jnp.float32)
    out = jax.block_until_ready(pyramid_pooling(x))
    assert out.shape == (B, 5 * C, H, W), out.shape
    assert out.dtype == x.dtype
    ref = ref_pyramid_pooling(np.asarray(x, dtype=np.float32))
    np.testing.assert_allclose(np.asarray(out), ref, rtol=1e-4, atol=1e-4)

    # Case 2: bf16 input, channels already a multiple of 8 (no padding, 2-pass
    # matmuls).  Output stays bf16 (matches the module), so compare loosely.
    xb = jax.random.normal(jax.random.PRNGKey(1), (2, 8, 16, 16),
                           dtype=jnp.bfloat16)
    outb = jax.block_until_ready(pyramid_pooling(xb))
    assert outb.shape == (2, 40, 16, 16), outb.shape
    assert outb.dtype == jnp.bfloat16
    refb = ref_pyramid_pooling(np.asarray(xb, dtype=np.float32))
    np.testing.assert_allclose(np.asarray(outb, dtype=np.float32), refb,
                               rtol=2e-2, atol=2e-2)

    print("KERNEL_OK")
</pallas_src>

<mosaic_0001>
module attributes {stable_mosaic.version = 11 : i64} {
  func.func @kernel(%arg0: i32, %arg1: i32, %arg2: memref<1x8x256xf32, #tpu.memory_space<vmem>>, %arg3: memref<256x56xbf16, #tpu.memory_space<vmem>>, %arg4: memref<256x56xbf16, #tpu.memory_space<vmem>>, %arg5: memref<56x1024xbf16, #tpu.memory_space<vmem>>, %arg6: memref<56x1024xbf16, #tpu.memory_space<vmem>>, %arg7: memref<1x5x8x256xf32, #tpu.memory_space<vmem>>) attributes {dimension_semantics = [#tpu.dimension_semantics<parallel>, #tpu.dimension_semantics<parallel>], iteration_bounds = array<i64: 2, 1>, scalar_prefetch = 0 : i64, scratch_operands = 0 : i64, tpu.core_type = #tpu.core_type<tc>, window_params = [{transform_indices = @transform_0, window_bounds = array<i64: 1, 8, 256>}, {pipeline_mode = #tpu.pipeline_mode<synchronous>, transform_indices = @transform_1, window_bounds = array<i64: 256, 56>}, {pipeline_mode = #tpu.pipeline_mode<synchronous>, transform_indices = @transform_2, window_bounds = array<i64: 256, 56>}, {pipeline_mode = #tpu.pipeline_mode<synchronous>, transform_indices = @transform_3, window_bounds = array<i64: 56, 1024>}, {pipeline_mode = #tpu.pipeline_mode<synchronous>, transform_indices = @transform_4, window_bounds = array<i64: 56, 1024>}, {transform_indices = @transform_5, window_bounds = array<i64: 1, 5, 8, 256>}]} {
    %c0 = arith.constant 0 : index
    %c0_0 = arith.constant 0 : index
    %c0_1 = arith.constant 0 : index
    %0 = vector.load %arg2[%c0, %c0_0, %c0_1] : memref<1x8x256xf32, #tpu.memory_space<vmem>>, vector<1x8x256xf32>
    %1 = vector.shape_cast %0 : vector<1x8x256xf32> to vector<8x256xf32>
    %c0_2 = arith.constant 0 : index
    %c0_3 = arith.constant 0 : index
    %c0_4 = arith.constant 0 : index
    %c0_5 = arith.constant 0 : index
    %2 = vector.load %arg7[%c0_2, %c0_3, %c0_4, %c0_5] : memref<1x5x8x256xf32, #tpu.memory_space<vmem>>, vector<1x1x8x256xf32>
    %3 = vector.shape_cast %2 : vector<1x1x8x256xf32> to vector<8x256xf32>
    %4 = vector.shape_cast %1 : vector<8x256xf32> to vector<1x1x8x256xf32>
    tpu.vector_store %arg7[%c0_2, %c0_3, %c0_4, %c0_5], %4 {strides = array<i32>} : memref<1x5x8x256xf32, #tpu.memory_space<vmem>>, vector<1x1x8x256xf32>,
    %5 = arith.truncf %1 : vector<8x256xf32> to vector<8x256xbf16>
    %6 = arith.extf %5 : vector<8x256xbf16> to vector<8x256xf32>
    %7 = arith.subf %1, %6 : vector<8x256xf32>
    %8 = arith.truncf %7 : vector<8x256xf32> to vector<8x256xbf16>
    %c0_6 = arith.constant 0 : index
    %c0_7 = arith.constant 0 : index
    %9 = vector.load %arg3[%c0_6, %c0_7] : memref<256x56xbf16, #tpu.memory_space<vmem>>, vector<256x56xbf16>
    %cst = arith.constant dense<0.000000e+00> : vector<8x56xf32>
    %10 = tpu.matmul %5, %9, %cst {dimension_numbers = #tpu.dot_dimension_numbers<[1], [0], [0], [1], [0, 0, 1, 1], [], []>} : vector<8x256xbf16>, vector<256x56xbf16>, vector<8x56xf32> -> vector<8x56xf32>
    %c0_8 = arith.constant 0 : index
    %c0_9 = arith.constant 0 : index
    %11 = vector.load %arg4[%c0_8, %c0_9] : memref<256x56xbf16, #tpu.memory_space<vmem>>, vector<256x56xbf16>
    %cst_10 = arith.constant dense<0.000000e+00> : vector<8x56xf32>
    %12 = tpu.matmul %5, %11, %cst_10 {dimension_numbers = #tpu.dot_dimension_numbers<[1], [0], [0], [1], [0, 0, 1, 1], [], []>} : vector<8x256xbf16>, vector<256x56xbf16>, vector<8x56xf32> -> vector<8x56xf32>
    %13 = arith.addf %10, %12 : vector<8x56xf32>
    %cst_11 = arith.constant dense<0.000000e+00> : vector<8x56xf32>
    %14 = tpu.matmul %8, %9, %cst_11 {dimension_numbers = #tpu.dot_dimension_numbers<[1], [0], [0], [1], [0, 0, 1, 1], [], []>} : vector<8x256xbf16>, vector<256x56xbf16>, vector<8x56xf32> -> vector<8x56xf32>
    %15 = arith.addf %13, %14 : vector<8x56xf32>
    %16 = arith.truncf %15 : vector<8x56xf32> to vector<8x56xbf16>
    %17 = arith.extf %16 : vector<8x56xbf16> to vector<8x56xf32>
    %18 = arith.subf %15, %17 : vector<8x56xf32>
    %19 = arith.truncf %18 : vector<8x56xf32> to vector<8x56xbf16>
    %c0_12 = arith.constant 0 : index
    %c0_13 = arith.constant 0 : index
    %20 = vector.load %arg5[%c0_12, %c0_13] : memref<56x1024xbf16, #tpu.memory_space<vmem>>, vector<56x1024xbf16>
    %cst_14 = arith.constant dense<0.000000e+00> : vector<8x1024xf32>
    %21 = tpu.matmul %16, %20, %cst_14 {dimension_numbers = #tpu.dot_dimension_numbers<[1], [0], [0], [1], [0, 0, 1, 1], [], []>} : vector<8x56xbf16>, vector<56x1024xbf16>, vector<8x1024xf32> -> vector<8x1024xf32>
    %c0_15 = arith.constant 0 : index
    %c0_16 = arith.constant 0 : index
    %22 = vector.load %arg6[%c0_15, %c0_16] : memref<56x1024xbf16, #tpu.memory_space<vmem>>, vector<56x1024xbf16>
    %cst_17 = arith.constant dense<0.000000e+00> : vector<8x1024xf32>
    %23 = tpu.matmul %16, %22, %cst_17 {dimension_numbers = #tpu.dot_dimension_numbers<[1], [0], [0], [1], [0, 0, 1, 1], [], []>} : vector<8x56xbf16>, vector<56x1024xbf16>, vector<8x1024xf32> -> vector<8x1024xf32>
    %24 = arith.addf %21, %23 : vector<8x1024xf32>
    %cst_18 = arith.constant dense<0.000000e+00> : vector<8x1024xf32>
    %25 = tpu.matmul %19, %20, %cst_18 {dimension_numbers = #tpu.dot_dimension_numbers<[1], [0], [0], [1], [0, 0, 1, 1], [], []>} : vector<8x56xbf16>, vector<56x1024xbf16>, vector<8x1024xf32> -> vector<8x1024xf32>
    %26 = arith.addf %24, %25 : vector<8x1024xf32>
    %27 = vector.extract_strided_slice %26 {offsets = [0, 0], sizes = [8, 256], strides = [1, 1]} : vector<8x1024xf32> to vector<8x256xf32>
    %c0_19 = arith.constant 0 : index
    %c1 = arith.constant 1 : index
    %c0_20 = arith.constant 0 : index
    %c0_21 = arith.constant 0 : index
    %28 = vector.load %arg7[%c0_19, %c1, %c0_20, %c0_21] : memref<1x5x8x256xf32, #tpu.memory_space<vmem>>, vector<1x1x8x256xf32>
    %29 = vector.shape_cast %28 : vector<1x1x8x256xf32> to vector<8x256xf32>
    %30 = vector.shape_cast %27 : vector<8x256xf32> to vector<1x1x8x256xf32>
    tpu.vector_store %arg7[%c0_19, %c1, %c0_20, %c0_21], %30 {strides = array<i32>} : memref<1x5x8x256xf32, #tpu.memory_space<vmem>>, vector<1x1x8x256xf32>,
    %31 = vector.extract_strided_slice %26 {offsets = [0, 256], sizes = [8, 256], strides = [1, 1]} : vector<8x1024xf32> to vector<8x256xf32>
    %c0_22 = arith.constant 0 : index
    %c2 = arith.constant 2 : index
    %c0_23 = arith.constant 0 : index
    %c0_24 = arith.constant 0 : index
    %32 = vector.load %arg7[%c0_22, %c2, %c0_23, %c0_24] : memref<1x5x8x256xf32, #tpu.memory_space<vmem>>, vector<1x1x8x256xf32>
    %33 = vector.shape_cast %32 : vector<1x1x8x256xf32> to vector<8x256xf32>
    %34 = vector.shape_cast %31 : vector<8x256xf32> to vector<1x1x8x256xf32>
    tpu.vector_store %arg7[%c0_22, %c2, %c0_23, %c0_24], %34 {strides = array<i32>} : memref<1x5x8x256xf32, #tpu.memory_space<vmem>>, vector<1x1x8x256xf32>,
    %35 = vector.extract_strided_slice %26 {offsets = [0, 512], sizes = [8, 256], strides = [1, 1]} : vector<8x1024xf32> to vector<8x256xf32>
    %c0_25 = arith.constant 0 : index
    %c3 = arith.constant 3 : index
    %c0_26 = arith.constant 0 : index
    %c0_27 = arith.constant 0 : index
    %36 = vector.load %arg7[%c0_25, %c3, %c0_26, %c0_27] : memref<1x5x8x256xf32, #tpu.memory_space<vmem>>, vector<1x1x8x256xf32>
    %37 = vector.shape_cast %36 : vector<1x1x8x256xf32> to vector<8x256xf32>
    %38 = vector.shape_cast %35 : vector<8x256xf32> to vector<1x1x8x256xf32>
    tpu.vector_store %arg7[%c0_25, %c3, %c0_26, %c0_27], %38 {strides = array<i32>} : memref<1x5x8x256xf32, #tpu.memory_space<vmem>>, vector<1x1x8x256xf32>,
    %39 = vector.extract_strided_slice %26 {offsets = [0, 768], sizes = [8, 256], strides = [1, 1]} : vector<8x1024xf32> to vector<8x256xf32>
    %c0_28 = arith.constant 0 : index
    %c4 = arith.constant 4 : index
    %c0_29 = arith.constant 0 : index
    %c0_30 = arith.constant 0 : index
    %40 = vector.load %arg7[%c0_28, %c4, %c0_29, %c0_30] : memref<1x5x8x256xf32, #tpu.memory_space<vmem>>, vector<1x1x8x256xf32>
    %41 = vector.shape_cast %40 : vector<1x1x8x256xf32> to vector<8x256xf32>
    %42 = vector.shape_cast %39 : vector<8x256xf32> to vector<1x1x8x256xf32>
    tpu.vector_store %arg7[%c0_28, %c4, %c0_29, %c0_30], %42 {strides = array<i32>} : memref<1x5x8x256xf32, #tpu.memory_space<vmem>>, vector<1x1x8x256xf32>,
    return
  }
  func.func @transform_0(%arg0: i32, %arg1: i32) -> (i32, i32, i32) {
    %c0_i32 = arith.constant 0 : i32
    %c0_i32_0 = arith.constant 0 : i32
    return %arg0, %arg1, %c0_i32 : i32, i32, i32
  }
  func.func @transform_1(%arg0: i32, %arg1: i32) -> (i32, i32) {
    %c0_i32 = arith.constant 0 : i32
    %c0_i32_0 = arith.constant 0 : i32
    %c0_i32_1 = arith.constant 0 : i32
    return %c0_i32, %c0_i32_0 : i32, i32
  }
  func.func @transform_2(%arg0: i32, %arg1: i32) -> (i32, i32) {
    %c0_i32 = arith.constant 0 : i32
    %c0_i32_0 = arith.constant 0 : i32
    %c0_i32_1 = arith.constant 0 : i32
    return %c0_i32, %c0_i32_0 : i32, i32
  }
  func.func @transform_3(%arg0: i32, %arg1: i32) -> (i32, i32) {
    %c0_i32 = arith.constant 0 : i32
    %c0_i32_0 = arith.constant 0 : i32
    %c0_i32_1 = arith.constant 0 : i32
    return %c0_i32, %c0_i32_0 : i32, i32
  }
  func.func @transform_4(%arg0: i32, %arg1: i32) -> (i32, i32) {
    %c0_i32 = arith.constant 0 : i32
    %c0_i32_0 = arith.constant 0 : i32
    %c0_i32_1 = arith.constant 0 : i32
    return %c0_i32, %c0_i32_0 : i32, i32
  }
  func.func @transform_5(%arg0: i32, %arg1: i32) -> (i32, i32, i32, i32) {
    %c0_i32 = arith.constant 0 : i32
    %c0_i32_0 = arith.constant 0 : i32
    %c0_i32_1 = arith.constant 0 : i32
    return %arg0, %c0_i32, %arg1, %c0_i32_0 : i32, i32, i32, i32
  }
}

module attributes {stable_mosaic.version = 11 : i64} {
  func.func @kernel(%arg0: i32, %arg1: i32, %arg2: memref<1x8x256xf32, #tpu.memory_space<vmem>>, %arg3: memref<256x56xbf16, #tpu.memory_space<vmem>>, %arg4: memref<256x56xbf16, #tpu.memory_space<vmem>>, %arg5: memref<56x1024xbf16, #tpu.memory_space<vmem>>, %arg6: memref<56x1024xbf16, #tpu.memory_space<vmem>>, %arg7: memref<1x5x8x256xf32, #tpu.memory_space<vmem>>) attributes {dimension_semantics = [#tpu.dimension_semantics<parallel>, #tpu.dimension_semantics<parallel>], iteration_bounds = array<i64: 2, 1>, scalar_prefetch = 0 : i64, scratch_operands = 0 : i64, tpu.core_type = #tpu.core_type<tc>, window_params = [{transform_indices = @transform_0, window_bounds = array<i64: 1, 8, 256>}, {pipeline_mode = #tpu.pipeline_mode<synchronous>, transform_indices = @transform_1, window_bounds = array<i64: 256, 56>}, {pipeline_mode = #tpu.pipeline_mode<synchronous>, transform_indices = @transform_2, window_bounds = array<i64: 256, 56>}, {pipeline_mode = #tpu.pipeline_mode<synchronous>, transform_indices = @transform_3, window_bounds = array<i64: 56, 1024>}, {pipeline_mode = #tpu.pipeline_mode<synchronous>, transform_indices = @transform_4, window_bounds = array<i64: 56, 1024>}, {transform_indices = @transform_5, window_bounds = array<i64: 1, 5, 8, 256>}]} {
    %c0 = arith.constant 0 : index
    %c0_0 = arith.constant 0 : index
    %c0_1 = arith.constant 0 : index
    %0 = vector.load %arg2[%c0, %c0_0, %c0_1] : memref<1x8x256xf32, #tpu.memory_space<vmem>>, vector<1x8x256xf32>
    %1 = vector.shape_cast %0 : vector<1x8x256xf32> to vector<8x256xf32>
    %c0_2 = arith.constant 0 : index
    %c0_3 = arith.constant 0 : index
    %c0_4 = arith.constant 0 : index
    %c0_5 = arith.constant 0 : index
    %2 = vector.load %arg7[%c0_2, %c0_3, %c0_4, %c0_5] : memref<1x5x8x256xf32, #tpu.memory_space<vmem>>, vector<1x1x8x256xf32>
    %3 = vector.shape_cast %2 : vector<1x1x8x256xf32> to vector<8x256xf32>
    %4 = vector.shape_cast %1 : vector<8x256xf32> to vector<1x1x8x256xf32>
    tpu.vector_store %arg7[%c0_2, %c0_3, %c0_4, %c0_5], %4 {strides = array<i32>} : memref<1x5x8x256xf32, #tpu.memory_space<vmem>>, vector<1x1x8x256xf32>,
    %5 = arith.truncf %1 : vector<8x256xf32> to vector<8x256xbf16>
    %6 = arith.extf %5 : vector<8x256xbf16> to vector<8x256xf32>
    %7 = arith.subf %1, %6 : vector<8x256xf32>
    %8 = arith.truncf %7 : vector<8x256xf32> to vector<8x256xbf16>
    %c0_6 = arith.constant 0 : index
    %c0_7 = arith.constant 0 : index
    %9 = vector.load %arg3[%c0_6, %c0_7] : memref<256x56xbf16, #tpu.memory_space<vmem>>, vector<256x56xbf16>
    %cst = arith.constant dense<0.000000e+00> : vector<8x56xf32>
    %10 = tpu.matmul %5, %9, %cst {dimension_numbers = #tpu.dot_dimension_numbers<[1], [0], [0], [1], [0, 0, 1, 1], [], []>} : vector<8x256xbf16>, vector<256x56xbf16>, vector<8x56xf32> -> vector<8x56xf32>
    %c0_8 = arith.constant 0 : index
    %c0_9 = arith.constant 0 : index
    %11 = vector.load %arg4[%c0_8, %c0_9] : memref<256x56xbf16, #tpu.memory_space<vmem>>, vector<256x56xbf16>
    %cst_10 = arith.constant dense<0.000000e+00> : vector<8x56xf32>
    %12 = tpu.matmul %5, %11, %cst_10 {dimension_numbers = #tpu.dot_dimension_numbers<[1], [0], [0], [1], [0, 0, 1, 1], [], []>} : vector<8x256xbf16>, vector<256x56xbf16>, vector<8x56xf32> -> vector<8x56xf32>
    %13 = arith.addf %10, %12 : vector<8x56xf32>
    %cst_11 = arith.constant dense<0.000000e+00> : vector<8x56xf32>
    %14 = tpu.matmul %8, %9, %cst_11 {dimension_numbers = #tpu.dot_dimension_numbers<[1], [0], [0], [1], [0, 0, 1, 1], [], []>} : vector<8x256xbf16>, vector<256x56xbf16>, vector<8x56xf32> -> vector<8x56xf32>
    %15 = arith.addf %13, %14 : vector<8x56xf32>
    %16 = arith.truncf %15 : vector<8x56xf32> to vector<8x56xbf16>
    %17 = arith.extf %16 : vector<8x56xbf16> to vector<8x56xf32>
    %18 = arith.subf %15, %17 : vector<8x56xf32>
    %19 = arith.truncf %18 : vector<8x56xf32> to vector<8x56xbf16>
    %c0_12 = arith.constant 0 : index
    %c0_13 = arith.constant 0 : index
    %20 = vector.load %arg5[%c0_12, %c0_13] : memref<56x1024xbf16, #tpu.memory_space<vmem>>, vector<56x1024xbf16>
    %cst_14 = arith.constant dense<0.000000e+00> : vector<8x1024xf32>
    %21 = tpu.matmul %16, %20, %cst_14 {dimension_numbers = #tpu.dot_dimension_numbers<[1], [0], [0], [1], [0, 0, 1, 1], [], []>} : vector<8x56xbf16>, vector<56x1024xbf16>, vector<8x1024xf32> -> vector<8x1024xf32>
    %c0_15 = arith.constant 0 : index
    %c0_16 = arith.constant 0 : index
    %22 = vector.load %arg6[%c0_15, %c0_16] : memref<56x1024xbf16, #tpu.memory_space<vmem>>, vector<56x1024xbf16>
    %cst_17 = arith.constant dense<0.000000e+00> : vector<8x1024xf32>
    %23 = tpu.matmul %16, %22, %cst_17 {dimension_numbers = #tpu.dot_dimension_numbers<[1], [0], [0], [1], [0, 0, 1, 1], [], []>} : vector<8x56xbf16>, vector<56x1024xbf16>, vector<8x1024xf32> -> vector<8x1024xf32>
    %24 = arith.addf %21, %23 : vector<8x1024xf32>
    %cst_18 = arith.constant dense<0.000000e+00> : vector<8x1024xf32>
    %25 = tpu.matmul %19, %20, %cst_18 {dimension_numbers = #tpu.dot_dimension_numbers<[1], [0], [0], [1], [0, 0, 1, 1], [], []>} : vector<8x56xbf16>, vector<56x1024xbf16>, vector<8x1024xf32> -> vector<8x1024xf32>
    %26 = arith.addf %24, %25 : vector<8x1024xf32>
    %27 = vector.extract_strided_slice %26 {offsets = [0, 0], sizes = [8, 256], strides = [1, 1]} : vector<8x1024xf32> to vector<8x256xf32>
    %c0_19 = arith.constant 0 : index
    %c1 = arith.constant 1 : index
    %c0_20 = arith.constant 0 : index
    %c0_21 = arith.constant 0 : index
    %28 = vector.load %arg7[%c0_19, %c1, %c0_20, %c0_21] : memref<1x5x8x256xf32, #tpu.memory_space<vmem>>, vector<1x1x8x256xf32>
    %29 = vector.shape_cast %28 : vector<1x1x8x256xf32> to vector<8x256xf32>
    %30 = vector.shape_cast %27 : vector<8x256xf32> to vector<1x1x8x256xf32>
    tpu.vector_store %arg7[%c0_19, %c1, %c0_20, %c0_21], %30 {strides = array<i32>} : memref<1x5x8x256xf32, #tpu.memory_space<vmem>>, vector<1x1x8x256xf32>,
    %31 = vector.extract_strided_slice %26 {offsets = [0, 256], sizes = [8, 256], strides = [1, 1]} : vector<8x1024xf32> to vector<8x256xf32>
    %c0_22 = arith.constant 0 : index
    %c2 = arith.constant 2 : index
    %c0_23 = arith.constant 0 : index
    %c0_24 = arith.constant 0 : index
    %32 = vector.load %arg7[%c0_22, %c2, %c0_23, %c0_24] : memref<1x5x8x256xf32, #tpu.memory_space<vmem>>, vector<1x1x8x256xf32>
    %33 = vector.shape_cast %32 : vector<1x1x8x256xf32> to vector<8x256xf32>
    %34 = vector.shape_cast %31 : vector<8x256xf32> to vector<1x1x8x256xf32>
    tpu.vector_store %arg7[%c0_22, %c2, %c0_23, %c0_24], %34 {strides = array<i32>} : memref<1x5x8x256xf32, #tpu.memory_space<vmem>>, vector<1x1x8x256xf32>,
    %35 = vector.extract_strided_slice %26 {offsets = [0, 512], sizes = [8, 256], strides = [1, 1]} : vector<8x1024xf32> to vector<8x256xf32>
    %c0_25 = arith.constant 0 : index
    %c3 = arith.constant 3 : index
    %c0_26 = arith.constant 0 : index
    %c0_27 = arith.constant 0 : index
    %36 = vector.load %arg7[%c0_25, %c3, %c0_26, %c0_27] : memref<1x5x8x256xf32, #tpu.memory_space<vmem>>, vector<1x1x8x256xf32>
    %37 = vector.shape_cast %36 : vector<1x1x8x256xf32> to vector<8x256xf32>
    %38 = vector.shape_cast %35 : vector<8x256xf32> to vector<1x1x8x256xf32>
    tpu.vector_store %arg7[%c0_25, %c3, %c0_26, %c0_27], %38 {strides = array<i32>} : memref<1x5x8x256xf32, #tpu.memory_space<vmem>>, vector<1x1x8x256xf32>,
    %39 = vector.extract_strided_slice %26 {offsets = [0, 768], sizes = [8, 256], strides = [1, 1]} : vector<8x1024xf32> to vector<8x256xf32>
    %c0_28 = arith.constant 0 : index
    %c4 = arith.constant 4 : index
    %c0_29 = arith.constant 0 : index
    %c0_30 = arith.constant 0 : index
    %40 = vector.load %arg7[%c0_28, %c4, %c0_29, %c0_30] : memref<1x5x8x256xf32, #tpu.memory_space<vmem>>, vector<1x1x8x256xf32>
    %41 = vector.shape_cast %40 : vector<1x1x8x256xf32> to vector<8x256xf32>
    %42 = vector.shape_cast %39 : vector<8x256xf32> to vector<1x1x8x256xf32>
    tpu.vector_store %arg7[%c0_28, %c4, %c0_29, %c0_30], %42 {strides = array<i32>} : memref<1x5x8x256xf32, #tpu.memory_space<vmem>>, vector<1x1x8x256xf32>,
    return
  }
  func.func @transform_0(%arg0: i32, %arg1: i32) -> (i32, i32, i32) {
    %c0_i32 = arith.constant 0 : i32
    %c0_i32_0 = arith.constant 0 : i32
    return %arg0, %arg1, %c0_i32 : i32, i32, i32
  }
  func.func @transform_1(%arg0: i32, %arg1: i32) -> (i32, i32) {
    %c0_i32 = arith.constant 0 : i32
    %c0_i32_0 = arith.constant 0 : i32
    %c0_i32_1 = arith.constant 0 : i32
    return %c0_i32, %c0_i32_0 : i32, i32
  }
  func.func @transform_2(%arg0: i32, %arg1: i32) -> (i32, i32) {
    %c0_i32 = arith.constant 0 : i32
    %c0_i32_0 = arith.constant 0 : i32
    %c0_i32_1 = arith.constant 0 : i32
    return %c0_i32, %c0_i32_0 : i32, i32
  }
  func.func @transform_3(%arg0: i32, %arg1: i32) -> (i32, i32) {
    %c0_i32 = arith.constant 0 : i32
    %c0_i32_0 = arith.constant 0 : i32
    %c0_i32_1 = arith.constant 0 : i32
    return %c0_i32, %c0_i32_0 : i32, i32
  }
  func.func @transform_4(%arg0: i32, %arg1: i32) -> (i32, i32) {
    %c0_i32 = arith.constant 0 : i32
    %c0_i32_0 = arith.constant 0 : i32
    %c0_i32_1 = arith.constant 0 : i32
    return %c0_i32, %c0_i32_0 : i32, i32
  }
  func.func @transform_5(%arg0: i32, %arg1: i32) -> (i32, i32, i32, i32) {
    %c0_i32 = arith.constant 0 : i32
    %c0_i32_0 = arith.constant 0 : i32
    %c0_i32_1 = arith.constant 0 : i32
    return %arg0, %c0_i32, %arg1, %c0_i32_0 : i32, i32, i32, i32
  }
}

</mosaic_0001>

<bundles_post_ra>
// kernel: tpu_custom_call.1
= control target key start
LH: loop header
LB: loop body
LE: loop exit
PB: predicated region body
PF: predicated region fallthrough
CT: control target
= control target key end

     0   :  { %10 = vsyncpa [#allocation3], 0  ;;  %s2641_s0 = inlined_call_operand.vmem [shape: f32[2,8,256], index: 0, kind: input, shape index: {}]   ;;  %s2642_s1 = inlined_call_operand.vmem [shape: bf16[256,56], index: 1, kind: input, shape index: {}]   ;;  %s2643_s2 = inlined_call_operand.vmem [shape: bf16[256,56], index: 2, kind: input, shape index: {}]   ;;  %s2644_s3 = inlined_call_operand.vmem [shape: bf16[56,1024], index: 3, kind: input, shape index: {}]   ;;  %s2645_s4 = inlined_call_operand.hbm [shape: bf16[56,1024], index: 4, kind: input, shape index: {}]   ;;  %s2646_s5 = inlined_call_operand.hbm [shape: f32[2,5,8,256], index: 5, kind: output, shape index: {}]  }
   0x1   :  { %11 = vsyncpa [#allocation4], 0 }
   0x2   :  { %13 = vsyncpa [#allocation4 + $0x1], 0  ;;  %s2183_s18 = smov 0   ;;  %s2185_s19 = smov 0  }
   0x3   :  { %s2187_s20 = smov 0   ;;  %s2189_s21 = smov 0  }
   0x4   :  { %s2191_s22 = smov 0   ;;  %s2193_s23 = smov 0  }
   0x5 LB: > { %s1674_s24 = sadd.s32 4294967295, %s2144_s23   ;;  %s1675_s25 = sadd.s32 4294967294, %s2144_s23   ;;  %s2144_s23 = sphi %s2193_s23, %s19_s23   ;;  %s2140_s22 = sphi %s2191_s22, %s2664_s22   ;;  %s2136_s21 = sphi %s2189_s21, %s2663_s21   ;;  %s2132_s20 = sphi %s2187_s20, %s2662_s20   ;;  %s2128_s19 = sphi %s2185_s19, %s2661_s19   ;;  %s2124_s18 = sphi %s2183_s18, %s2660_s18  }
   0x6   : > { %s31_s26 = sadd.s32 1, %s2140_s22  ;;  %s152_s27 = sadd.s32 1, %s2132_s20 }
   0x7   : > { %p33_p0 = scmp.ge.s32.totalorder %s31_s26, 2  ;;  %p162_p1 = scmp.ne.s32.totalorder %s2132_s20, %s2128_s19 }
   0x8   : > { %p163_p2 = scmp.eq.s32.totalorder %s1674_s24, 1  ;;  %p168_p3 = scmp.ne.s32.totalorder %s2128_s19, %s2124_s18 }
   0x9   : > { %s2666_s26 = smov (%p33_p0, %s31_s26), 0  ;;  %p169_p5 = scmp.eq.s32.totalorder %s1675_s25, 1 }
   0xa   : > { %p2223_p4 = por %p163_p2, %p162_p1  ;;  %s147_s29 = ssub.s32 %s2140_s22, %s2666_s26 }
   0xb   : > { %p1676_p6 = scmp.ge.s32.totalorder %s2144_s23, 1  ;;  %p150_p7 = scmp.eq.s32.totalorder %s147_s29, 0 }
   0xc   : > { %s2651_s28 = scalar_select %p2223_p4, 1, 0 }
   0xd   : > { %p2230_p8 = por %p169_p5, %p168_p3  ;;  %p176_p9 = scmp.lt.s32.totalorder %s2144_s23, 3 }
   0xe   : > { %s2236_s6 = scalar_select %p150_p7, %s2132_s20, %s152_s27  }
   0xf   : > { %s2652_s30 = scalar_select %p2230_p8, 1, 0 }
  0x10   : > { %p2238_p10 = pnand %p1676_p6, %p176_p9  ;;  %p2242_p11 = scmp.eq.s32.totalorder %s1674_s24, 0 }
  0x11   : > { %s2146_s9 = smov [#allocation2]   ;;  %s2034_s14 = scalar_lea.hbm %s2645_s4, 3584 }
  0x12   : > { %s2653_s7 = scalar_select %p2238_p10, 1, 0 }
  0x13   : > { %s2654_s8 = scalar_select %p2242_p11, 1, 0 }
  0x14   : > { %p1921_p12 = pneg %p2238_p10  ;;  %s197_s10 = sshll.u32 %s2146_s9, 4  ;;  %s198_s10 = int_to_ptr.vmem [resolvable:$true] %s197_s10 }
  0x15   : > { %p2035_p0 = scmp.ne.s32.totalorder %s2645_s4, %s2034_s14  ;;  %p2041_p5 = scmp.lt.u32.totalorder %s2034_s14, %s2645_s4 }
  0x16   : > { %p2250_p13 = pnand %p2242_p11, %p1921_p12 }
  0x18   : > { %p2036_p1 = pneg %p2250_p13 }
  0x1a   : > { %p2037_p2 = pnand %p2036_p1, %p2035_p0 }
  0x1c   : > { %p2038_p3 = pneg %p2037_p2 }
  0x1e   : > { %p2043_p6 = pnand %p2041_p5, %p2038_p3 }
  0x20   : > { %2046 = shalt.err (!%p2043_p6)
}
  0x21   : > { %s2047_s25 = scalar_lea.vmem %s198_s10, 3584  ;;  %p2055_p8 = scmp.lt.s32.totalorder %s198_s10, %s198_s10 }
  0x22   : > { %p2048_p7 = scmp.ne.s32.totalorder %s198_s10, %s2047_s25  ;;  %p2056_p4 = scmp.lt.s32.totalorder %s2047_s25, %s2047_s25 }
  0x24   : > { %p2050_p9 = pnand %p2048_p7, %p2036_p1  ;;  %p2057_p11 = por %p2056_p4, %p2055_p8 }
  0x26   : > { %p2051_p12 = pneg %p2050_p9 }
  0x28   : > { %p2058_p10 = pnand %p2057_p11, %p2051_p12 }
  0x2a   : > { %2061 = shalt.err (!%p2058_p10)
}
  0x2b   : > { %s2147_s27 = smov 512   ;;  %s2148_s29 = smov 32  }
  0x2c   : > { %1924 = dma.hbm_to_vmem [thread:$0]  (!%p2250_p13), %s2645_s4, 3584, %s198_s10, [#allocation3], %s2147_s27, %s2147_s27, %s2148_s29  }
  0x2d   : > { %p2656_p0 = scmp.ne.s32.totalorder %s2653_s7, 0 }
  0x2e   : > { %p2657_p2 = scmp.ne.s32.totalorder (!%p2656_p0), %s2654_s8, 0 }
  0x2f   : > { %225 = sbr.rel (%p2656_p0) target bundleno = 728 (0x2d8), region = 40 }
  0x36   : > { %2115 = dma.done.wait (%p2657_p2), [#allocation3], 3584  }
  0x37   : > { %2117 = vsyncadd (%p2657_p2), [#allocation3], 4294963712  ;;  %v1986_v0 = vld [vmem:[%s2643_s2 + $0x40] sm:$0xff]   ;;  %v1988_v2 = vld [vmem:[%s2643_s2 + $0x48] sm:$0xff]   ;;  %p257_p4 = scmp.lt.s32.totalorder %s2136_s21, 1  ;;  %s254_s13 = sand.u32 1, %s2128_s19  }
  0x38   : > { %v1987_v1 = vld [vmem:[%s2643_s2] sm:$0xff]   ;;  %1815 = vmatprep.subr.bf16.mxu0 %v1986_v0  ;;  %v1989_v3 = vld [vmem:[%s2643_s2 + $0x8] sm:$0xff]   ;;  %v1990_v4 = vld [vmem:[%s2643_s2 + $0x50] sm:$0xff]   ;;  %s1913_s8 = smul.u32 80, %s254_s13  ;;  %vm860_vm0 = vcmask 1043456   ;;  %vm856_vm1 = vcmask 457728  }
  0x39   : > { %1816 = vmatpush3.bf16.msra.mxu0 %v1987_v1  ;;  %s258_s25 = scalar_select %p257_p4, %s2136_s21, 1  ;;  %v1991_v5 = vld [vmem:[%s2643_s2 + $0x10] sm:$0xff]   ;;  %v1992_v6 = vld [vmem:[%s2643_s2 + $0x58] sm:$0xff]   ;;  %v1994_v8 = vld [vmem:[%s2643_s2 + $0x60] sm:$0xff]  }
  0x3a   : > { %1817 = vmatprep.subr.bf16.mxu0 %v1988_v2  ;;  %v1993_v7 = vld [vmem:[%s2643_s2 + $0x18] sm:$0xff]   ;;  %v1995_v9 = vld [vmem:[%s2643_s2 + $0x20] sm:$0xff]   ;;  %v1996_v10 = vld [vmem:[%s2643_s2 + $0x68] sm:$0xff]   ;;  %s2319_s12 = scalar_lea.vmem [#allocation5], %s1913_s8  ;;  %s1914_s17 = smul.u32 1280, %s2136_s21 }
  0x3b   : > { %s1814_s14 = sshll.u32 %s258_s25, 4  ;;  %v1997_v14 = vld [vmem:[%s2643_s2 + $0x28] sm:$0xff]   ;;  %v1998_v15 = vld [vmem:[%s2643_s2 + $0x70] sm:$0xff]   ;;  %v2000_v17 = vld [vmem:[%s2643_s2 + $0x78] sm:$0xff]   ;;  %s2595_s9 = scalar_lea.sflag [#allocation4], %s254_s13 }
  0x3c   : > { %s265_s24 = scalar_lea.vmem %s2641_s0, %s1814_s14  ;;  %v1999_v16 = vld [vmem:[%s2643_s2 + $0x30] sm:$0xff]   ;;  %v2001_v18 = vld [vmem:[%s2643_s2 + $0x38] sm:$0xff]   ;;  %v2002_v19 = vld [vmem:[%s2642_s1 + $0x40] sm:$0xff]   ;;  %s2587_s25 = scalar_lea.hbm %s2646_s5, %s1914_s17 }
  0x3d   : > { %1818 = vmatpush3.bf16.msra.mxu0 %v1989_v3  ;;  %v268_v11 = vld [vmem:[%s265_s24 + $0x8] sm:$0xff]  ;;  %v2317_v12 = vld [vmem:[%s265_s24] sm:$0xff]  ;;  %v2006_v24 = vld [vmem:[%s2642_s1 + $0x50] sm:$0xff]   ;;  %s1580_s24 = sshll.u32 %s2319_s12, 4  ;;  %p2658_p10 = scmp.ne.s32.totalorder %s2651_s28, 0  ;;  %s2589_s24 = int_to_ptr.vmem [resolvable:$true] %s1580_s24 }
  0x3e   : > { %1819 = vmatprep.subr.bf16.mxu0 %v1990_v4  ;;  %270 = vst [vmem:[%s2319_s12 + $0x8] sm:$0xff] %v268_v11  ;;  %v272_v13 = vpack.c.bf16 %v268_v11, %v268_v11  ;;  %269 = vst [vmem:[%s2319_s12] sm:$0xff] %v2317_v12  ;;  %v271_v20 = vpack.c.bf16 %v2317_v12, %v2317_v12  ;;  %v2003_v21 = vld [vmem:[%s2642_s1] sm:$0xff]   ;;  %v2004_v22 = vld [vmem:[%s2642_s1 + $0x48] sm:$0xff]   ;;  %s2062_s21 = scalar_lea.vmem %s2589_s24, 1280  ;;  %s2150_s14 = smov [#allocation5]  }
  0x3f   : > { %v2005_v23 = vld [vmem:[%s2642_s1 + $0x8] sm:$0xff]   ;;  %v2007_v25 = vld [vmem:[%s2642_s1 + $0x10] sm:$0xff]   ;;  %v2008_v26 = vld [vmem:[%s2642_s1 + $0x58] sm:$0xff]   ;;  %p2063_p8 = scmp.ne.s32.totalorder %s2589_s24, %s2062_s21  ;;  %s2066_s11 = sshll.u32 %s2150_s14, 4  ;;  %s2067_s11 = int_to_ptr.vmem [resolvable:$false] %s2066_s11 }
  0x40   : > { %471 = vmatprep.mubr.bf16.mxu0 %v272_v13  ;;  %v2009_v27 = vld [vmem:[%s2642_s1 + $0x18] sm:$0xff]   ;;  %v2010_v28 = vld [vmem:[%s2642_s1 + $0x60] sm:$0xff]   ;;  %v2012_v30 = vld [vmem:[%s2642_s1 + $0x68] sm:$0xff]   ;;  %v274_v34 = vunpack.c.l.bf16 %v272_v13  ;;  %v273_v39 = vunpack.c.l.bf16 %v271_v20  ;;  %s2068_s15 = scalar_lea.vmem %s2067_s11, 2560  ;;  %p2069_p1 = scmp.lt.s32.totalorder %s2589_s24, %s2067_s11 }
  0x41   : > { %1820 = vmatpush3.bf16.msra.mxu0 %v1991_v5  ;;  %v2011_v29 = vld [vmem:[%s2642_s1 + $0x20] sm:$0xff]   ;;  %v2013_v31 = vld [vmem:[%s2642_s1 + $0x28] sm:$0xff]   ;;  %v2014_v32 = vld [vmem:[%s2642_s1 + $0x70] sm:$0xff]   ;;  %p2064_p11 = pnand %p2063_p8, %p2658_p10  ;;  %p2070_p3 = scmp.lt.s32.totalorder %s2068_s15, %s2062_s21 }
  0x42   : > { %1821 = vmatprep.subr.bf16.mxu0 %v1992_v6  ;;  %v2015_v33 = vld [vmem:[%s2642_s1 + $0x30] sm:$0xff]   ;;  %v2016_v35 = vld [vmem:[%s2642_s1 + $0x78] sm:$0xff]   ;;  %v276_v37 = vsub.f32 %v268_v11, %v274_v34  ;;  %v275_v40 = vsub.f32 %v2317_v12, %v273_v39  ;;  %v688_v42 = vld [vmem:[#allocation2] sm:$0xff] }
  0x43   : > { %v2017_v36 = vld [vmem:[%s2642_s1 + $0x38] sm:$0xff]   ;;  %v692_v43 = vld [vmem:[#allocation2 + $0x20] sm:$0xff]  ;;  %v690_v44 = vld [vmem:[#allocation2 + $0x10] sm:$0xff]  ;;  %p2065_p13 = pneg %p2064_p11  ;;  %p2071_p5 = por %p2070_p3, %p2069_p1 }
  0x44   : > { %v278_v38 = vpack.c.bf16 %v276_v37, %v276_v37  ;;  %v277_v41 = vpack.c.bf16 %v275_v40, %v275_v40  ;;  %v1716_v45 = vcombine.high %v688_v42, %v692_v43  ;;  %v694_v46 = vld [vmem:[#allocation2 + $0x30] sm:$0xff]  ;;  %v1715_v47 = vcombine.low %v688_v42, %v692_v43  ;;  %v696_v48 = vld [vmem:[#allocation2 + $0x40] sm:$0xff]  ;;  %v693_v11 = vld [vmem:[#allocation2 + $0x28] sm:$0xff] }
  0x45   : > { %1822 = vmatpush3.bf16.msra.mxu0 %v1993_v7  ;;  %v700_v49 = vld [vmem:[#allocation2 + $0x60] sm:$0xff]  ;;  %v1719_v50 = vcombine.low %v690_v44, %v694_v46  ;;  %v1720_v51 = vcombine.high %v690_v44, %v694_v46  ;;  %v698_v53 = vld [vmem:[#allocation2 + $0x50] sm:$0xff]  ;;  %v697_v34 = vld [vmem:[#allocation2 + $0x48] sm:$0xff]  ;;  %p2072_p6 = pnand %p2071_p5, %p2065_p13 }
  0x46   : > { %1823 = vmatprep.subr.bf16.mxu0 %v1994_v8  ;;  %v1724_v52 = vcombine.high %v696_v48, %v700_v49  ;;  %v702_v54 = vld [vmem:[#allocation2 + $0x70] sm:$0xff]  ;;  %v704_v55 = vld [vmem:[#allocation2 + $0x80] sm:$0xff]  ;;  %885 = vmatprep.subr.bf16.mxu1 %v1716_v45  ;;  %v1723_v60 = vcombine.low %v696_v48, %v700_v49  ;;  %v705_v43 = vld [vmem:[#allocation2 + $0x88] sm:$0xff] }
  0x47   : > { %v1728_v56 = vcombine.high %v698_v53, %v702_v54  ;;  %v708_v57 = vld [vmem:[#allocation2 + $0xa0] sm:$0xff]  ;;  %v706_v58 = vld [vmem:[#allocation2 + $0x90] sm:$0xff]  ;;  %886 = vmatpush1.bf16.msra.mxu1 %v1715_v47  ;;  %v1727_v61 = vcombine.low %v698_v53, %v702_v54  ;;  %v709_v44 = vld [vmem:[#allocation2 + $0xa8] sm:$0xff] }
  0x48   : > { %v710_v59 = vld [vmem:[#allocation2 + $0xb0] sm:$0xff]  ;;  %887 = vmatprep.subr.bf16.mxu1 %v1724_v52  ;;  %v1732_v62 = vcombine.high %v704_v55, %v708_v57  ;;  %v1731_v1 = vcombine.low %v704_v55, %v708_v57  ;;  %v712_v2 = vld [vmem:[#allocation2 + $0xc0] sm:$0xff]  ;;  %v1734_v49 = vcombine.high %v705_v43, %v709_v44  ;;  %v1733_v53 = vcombine.low %v705_v43, %v709_v44 }
  0x49   : > { %1824 = vmatpush3.bf16.msra.mxu0 %v1995_v9  ;;  %v1736_v63 = vcombine.high %v706_v58, %v710_v59  ;;  %v1735_v0 = vcombine.low %v706_v58, %v710_v59  ;;  %v714_v3 = vld [vmem:[#allocation2 + $0xd0] sm:$0xff]  ;;  %v1740_v4 = vcombine.high %v712_v2, %v712_v2  ;;  %v1739_v6 = vcombine.low %v712_v2, %v712_v2  ;;  %v691_v59 = vld [vmem:[#allocation2 + $0x18] sm:$0xff] }
  0x4a   : > { %1825 = vmatprep.subr.bf16.mxu0 %v1996_v10  ;;  %v1744_v5 = vcombine.high %v714_v3, %v714_v3  ;;  %v1743_v7 = vcombine.low %v714_v3, %v714_v3  ;;  %v689_v10 = vld [vmem:[#allocation2 + $0x8] sm:$0xff]  ;;  %v662_v12 = vld [vmem:[%s2644_s3 + $0x10] sm:$0xff] }
  0x4b   : > { %888 = vmatpush1.bf16.msra.mxu1 %v1723_v60  ;;  %v862_v8 = vsel %vm860_vm0, %v1739_v6, 0  ;;  %v670_v37 = vld [vmem:[%s2644_s3 + $0x50] sm:$0xff]  ;;  %v695_v60 = vld [vmem:[#allocation2 + $0x38] sm:$0xff] }
  0x4c   : > { %889 = vmatprep.subr.bf16.mxu1 %v1732_v62  ;;  %v874_v9 = vsel %vm860_vm0, %v1743_v7, 0  ;;  %v678_v45 = vld [vmem:[%s2644_s3 + $0x90] sm:$0xff]  ;;  %v1721_v2 = vcombine.low %v691_v59, %v695_v60 }
  0x4d   : > { %1826 = vmatpush3.bf16.msra.mxu0 %v1997_v14  ;;  %v666_v14 = vld [vmem:[%s2644_s3 + $0x30] sm:$0xff] }
  0x4e   : > { %1827 = vmatprep.subr.bf16.mxu0 %v1998_v15  ;;  %v1717_v15 = vcombine.low %v689_v10, %v693_v11  ;;  %v682_v46 = vld [vmem:[%s2644_s3 + $0xb0] sm:$0xff] }
  0x4f   : > { %890 = vmatpush1.bf16.msra.mxu1 %v1731_v1  ;;  %v686_v52 = vld [vmem:[%s2644_s3 + $0xd0] sm:$0xff]  ;;  %v1775_v54 = vcombine.low %v678_v45, %v682_v46  ;;  %v703_v1 = vld [vmem:[#allocation2 + $0x78] sm:$0xff] }
  0x50   : > { %1747 = vmatprep.subr.msk.bf16.mxu1 %vm860_vm0, %v1740_v4  ;;  %v1783_v58 = vcombine.low %v686_v52, %v686_v52  ;;  %v707_v4 = vld [vmem:[#allocation2 + $0x98] sm:$0xff] }
  0x51   : > { %1828 = vmatpush3.bf16.msra.mxu0 %v1999_v16  ;;  %v2400_v16 = vcombine.low %v662_v12, %v666_v14 }
  0x52   : > { %1829 = vmatprep.subr.bf16.mxu0 %v2000_v17  ;;  %v2402_v17 = vcombine.high %v662_v12, %v666_v14  ;;  %v1202_v62 = vsel %vm860_vm0, %v1783_v58, 0  ;;  %v664_v14 = vld [vmem:[%s2644_s3 + $0x20] sm:$0xff]  ;;  %v683_v58 = vld [vmem:[%s2644_s3 + $0xb8] sm:$0xff] }
  0x53   : > { %892 = vmatpush1.bf16.msra.mxu1 %v862_v8  ;;  %v715_v8 = vld [vmem:[#allocation2 + $0xd8] sm:$0xff] }
  0x54   : > { %v1745_v12 = vcombine.low %v715_v8, %v715_v8 }
  0x55   : > { %1830 = vmatpush3.bf16.msra.mxu0 %v2001_v18  ;;  %v2149_v18 = vmov 0  }
  0x56   : > { %1837 = vmatprep.subr.bf16.mxu0 %v2002_v19  ;;  %917 = vmatprep.mubr.bf16.mxu1 %v2149_v18 }
  0x58   : > { %472 = vmatmul.mubr.bf16.vlgmr.msra.gmra.mrb[0].mxu0 %v271_v20 }
  0x59   : > { %1838 = vmatpush3.bf16.msra.mxu0 %v2003_v21  ;;  %607 = vmatprep.mubr.bf16.mxu0 %v272_v13  ;;  %v1718_v13 = vcombine.high %v689_v10, %v693_v11  ;;  %v1746_v11 = vcombine.high %v715_v8, %v715_v8 }
  0x5a   : > { %1839 = vmatprep.subr.bf16.mxu0 %v2004_v22 }
  0x5b   : > { %926 = vmatprep.subr.bf16.mxu1 %v1718_v13  ;;  %v660_v13 = vld [vmem:[%s2644_s3] sm:$0xff] }
  0x5d   : > { %1840 = vmatpush3.bf16.msra.mxu0 %v2005_v23 }
  0x5e   : > { %1841 = vmatprep.subr.bf16.mxu0 %v2006_v24 }
  0x61   : > { %1842 = vmatpush3.bf16.msra.mxu0 %v2007_v25 }
  0x62   : > { %1843 = vmatprep.subr.bf16.mxu0 %v2008_v26 }
  0x65   : > { %1844 = vmatpush3.bf16.msra.mxu0 %v2009_v27 }
  0x66   : > { %1845 = vmatprep.subr.bf16.mxu0 %v2010_v28 }
  0x69   : > { %1846 = vmatpush3.bf16.msra.mxu0 %v2011_v29 }
  0x6a   : > { %1847 = vmatprep.subr.bf16.mxu0 %v2012_v30 }
  0x6d   : > { %1848 = vmatpush3.bf16.msra.mxu0 %v2013_v31 }
  0x6e   : > { %1849 = vmatprep.subr.bf16.mxu0 %v2014_v32 }
  0x71   : > { %1850 = vmatpush3.bf16.msra.mxu0 %v2015_v33 }
  0x72   : > { %1851 = vmatprep.subr.bf16.mxu0 %v2016_v35 }
  0x75   : > { %1852 = vmatpush3.bf16.msra.mxu0 %v2017_v36 }
  0x76   : > { %1859 = vmatprep.subr.bf16.mxu0 %v2002_v19 }
  0x78   : > { %608 = vmatmul.mubr.bf16.vlgmr.msra.gmra.mrb[4].mxu0 %v271_v20 }
  0x79   : > { %1860 = vmatpush3.bf16.msra.mxu0 %v2003_v21  ;;  %647 = vmatprep.mubr.bf16.mxu0 %v278_v38  ;;  %v674_v38 = vld [vmem:[%s2644_s3 + $0x70] sm:$0xff] }
  0x7a   : > { %1861 = vmatprep.subr.bf16.mxu0 %v2004_v22  ;;  %v1768_v42 = vcombine.high %v670_v37, %v674_v38  ;;  %v1767_v48 = vcombine.low %v670_v37, %v674_v38  ;;  %v673_v37 = vld [vmem:[%s2644_s3 + $0x68] sm:$0xff] }
  0x7d   : > { %1862 = vmatpush3.bf16.msra.mxu0 %v2005_v23 }
  0x7e   : > { %1863 = vmatprep.subr.bf16.mxu0 %v2006_v24 }
  0x81   : > { %1864 = vmatpush3.bf16.msra.mxu0 %v2007_v25 }
  0x82   : > { %1865 = vmatprep.subr.bf16.mxu0 %v2008_v26 }
  0x85   : > { %1866 = vmatpush3.bf16.msra.mxu0 %v2009_v27 }
  0x86   : > { %1867 = vmatprep.subr.bf16.mxu0 %v2010_v28 }
  0x89   : > { %1868 = vmatpush3.bf16.msra.mxu0 %v2011_v29 }
  0x8a   : > { %1869 = vmatprep.subr.bf16.mxu0 %v2012_v30 }
  0x8d   : > { %1870 = vmatpush3.bf16.msra.mxu0 %v2013_v31 }
  0x8e   : > { %1871 = vmatprep.subr.bf16.mxu0 %v2014_v32 }
  0x91   : > { %1872 = vmatpush3.bf16.msra.mxu0 %v2015_v33 }
  0x92   : > { %1873 = vmatprep.subr.bf16.mxu0 %v2016_v35 }
  0x95   : > { %1874 = vmatpush3.bf16.msra.mxu0 %v2017_v36  ;;  %v701_v36 = vld [vmem:[#allocation2 + $0x68] sm:$0xff] }
  0x96   : > { %967 = vmatprep.subr.bf16.mxu0 %v1720_v51  ;;  %v1725_v47 = vcombine.low %v697_v34, %v701_v36  ;;  %v713_v51 = vld [vmem:[#allocation2 + $0xc8] sm:$0xff] }
  0x97   : > { %v1742_v55 = vcombine.high %v713_v51, %v713_v51  ;;  %v1741_v57 = vcombine.low %v713_v51, %v713_v51 }
  0x98   : > { %648 = vmatmul.mubr.bf16.vlgmr.msra.gmra.mrb[8].mxu0 %v277_v41  ;;  %v1726_v41 = vcombine.high %v697_v34, %v701_v36  ;;  %v669_v36 = vld [vmem:[%s2644_s3 + $0x48] sm:$0xff] }
  0x99   : > { %968 = vmatpush1.bf16.msra.mxu0 %v1719_v50  ;;  %999 = vmatprep.mubr.bf16.mxu0 %v2149_v18  ;;  %v1776_v50 = vcombine.high %v678_v45, %v682_v46  ;;  %v1765_v43 = vcombine.low %v669_v36, %v673_v37  ;;  %v685_v45 = vld [vmem:[%s2644_s3 + $0xc8] sm:$0xff] }
  0x9a   : > { %969 = vmatprep.subr.bf16.mxu0 %v1728_v56  ;;  %v1784_v56 = vcombine.high %v686_v52, %v686_v52 }
  0x9d   : > { %970 = vmatpush1.bf16.msra.mxu0 %v1727_v61  ;;  %v868_v61 = vsel %vm860_vm0, %v1741_v57, 0  ;;  %v679_v57 = vld [vmem:[%s2644_s3 + $0x98] sm:$0xff] }
  0x9e   : > { %971 = vmatprep.subr.bf16.mxu0 %v1736_v63  ;;  %v1722_v63 = vcombine.high %v691_v59, %v695_v60  ;;  %v1778_v60 = vcombine.high %v679_v57, %v683_v58 }
  0xa1   : > { %972 = vmatpush1.bf16.msra.mxu0 %v1735_v0  ;;  %v699_v0 = vld [vmem:[#allocation2 + $0x58] sm:$0xff] }
  0xa2   : > { %1751 = vmatprep.subr.msk.bf16.mxu0 %vm860_vm0, %v1744_v5  ;;  %v1730_v3 = vcombine.high %v699_v0, %v703_v1  ;;  %v711_v5 = vld [vmem:[#allocation2 + $0xb8] sm:$0xff]  ;;  %v1729_v6 = vcombine.low %v699_v0, %v703_v1 }
  0xa3   : > { %v1738_v7 = vcombine.high %v707_v4, %v711_v5 }
  0xa5   : > { %974 = vmatpush1.bf16.msra.mxu0 %v874_v9  ;;  %v1737_v9 = vcombine.low %v707_v4, %v711_v5 }
  0xa6   : > { %1295 = vmatprep.subr.bf16.mxu0 %v2402_v17 }
 0x12b   : > { %v1831_v19 = vpop.f32.mrb[0].mxu0 }
 0x12c   : > { %v1832_v20 = vpop.f32.mrb[1].mxu0 }
 0x12d   : > { %v1833_v21 = vadd.f32 %v1832_v20, %v1831_v19  ;;  %v1834_v22 = vpop.f32.mrb[2].mxu0  ;;  %v668_v19 = vld [vmem:[%s2644_s3 + $0x40] sm:$0xff] }
 0x12e   : > { %v1835_v23 = vpop.f32.mrb[3].mxu0  ;;  %v672_v20 = vld [vmem:[%s2644_s3 + $0x60] sm:$0xff] }
 0x12f   : > { %v2471_v23 = vcombine.high %v668_v19, %v672_v20 }
 0x14b   : > { %v1853_v24 = vpop.f32.mrb[4].mxu0 }
 0x14c   : > { %v1854_v25 = vpop.f32.mrb[5].mxu0 }
 0x14d   : > { %v1855_v26 = vadd.f32 %v1854_v25, %v1853_v24  ;;  %v1856_v27 = vpop.f32.mrb[6].mxu0  ;;  %v676_v24 = vld [vmem:[%s2644_s3 + $0x80] sm:$0xff] }
 0x14e   : > { %v1857_v28 = vpop.f32.mrb[7].mxu0  ;;  %v680_v25 = vld [vmem:[%s2644_s3 + $0xa0] sm:$0xff] }
 0x14f   : > { %v610_v29 = vadd.f32 %v1855_v26, %v1833_v21  ;;  %v2466_v21 = vcombine.low %v660_v13, %v664_v14  ;;  %v2484_v26 = vcombine.low %v668_v19, %v672_v20  ;;  %v2488_v27 = vcombine.high %v676_v24, %v680_v25  ;;  %v684_v28 = vld [vmem:[%s2644_s3 + $0xc0] sm:$0xff] }
 0x16b   : > { %v1875_v30 = vpop.f32.mrb[8].mxu0 }
 0x16c   : > { %v1876_v31 = vpop.f32.mrb[9].mxu0 }
 0x16d   : > { %v1877_v32 = vadd.f32 %v1876_v31, %v1875_v30  ;;  %v1878_v33 = vpop.f32.mrb[10].mxu0  ;;  %v2497_v30 = vcombine.high %v684_v28, %v684_v28  ;;  %v1779_v31 = vcombine.low %v684_v28, %v684_v28 }
 0x16e   : > { %v1879_v35 = vpop.f32.mrb[11].mxu0  ;;  %v665_v33 = vld [vmem:[%s2644_s3 + $0x28] sm:$0xff] }
 0x16f   : > { %v2413_v39 = vadd.f32 %v1877_v32, %v610_v29  ;;  %v2494_v29 = vcombine.low %v676_v24, %v680_v25  ;;  %v661_v32 = vld [vmem:[%s2644_s3 + $0x8] sm:$0xff]  ;;  %v1190_v34 = vsel %vm860_vm0, %v1779_v31, 0 }
 0x170   : > { %v1758_v35 = vcombine.high %v661_v32, %v665_v33  ;;  %v1757_v38 = vcombine.low %v661_v32, %v665_v33 }
 0x171   : > { %v2417_v40 = vpack.c.bf16 %v2413_v39, %v2413_v39 }
 0x173   : > { %1748 = vmatmul.mubr.msk.bf16.vlgmr.msra.gmra.mrb[0].mxu1 %vm856_vm1, %v2417_v40  ;;  %1752 = vmatmul.mubr.msk.bf16.vlgmr.msra.gmra.mrb[12].mxu0 %vm856_vm1, %v2417_v40  ;;  %v657_v10 = vunpack.c.l.bf16 %v2417_v40 }
 0x174   : > { %927 = vmatpush1.bf16.msra.mxu1 %v1717_v15  ;;  %1296 = vmatpush1.bf16.msra.mxu0 %v2400_v16 }
 0x175   : > { %928 = vmatprep.subr.bf16.mxu1 %v1726_v41  ;;  %1297 = vmatprep.subr.bf16.mxu0 %v1768_v42  ;;  %v658_v15 = vsub.f32 %v2413_v39, %v657_v10  ;;  %v1766_v39 = vcombine.high %v669_v36, %v673_v37  ;;  %v677_v41 = vld [vmem:[%s2644_s3 + $0x88] sm:$0xff] }
 0x176   : > { %958 = vmatprep.mubr.bf16.mxu1 %v2149_v18  ;;  %1327 = vmatprep.mubr.bf16.mxu0 %v2149_v18 }
 0x177   : > { %v2468_v22 = vpack.c.bf16 %v658_v15, %v658_v15 }
 0x178   : > { %929 = vmatpush1.bf16.msra.mxu1 %v1725_v47  ;;  %1298 = vmatpush1.bf16.msra.mxu0 %v1767_v48  ;;  %v1782_v47 = vcombine.high %v685_v45, %v685_v45 }
 0x179   : > { %930 = vmatprep.subr.bf16.mxu1 %v1734_v49  ;;  %1299 = vmatprep.subr.bf16.mxu0 %v1776_v50  ;;  %v663_v49 = vld [vmem:[%s2644_s3 + $0x18] sm:$0xff] }
 0x17c   : > { %931 = vmatpush1.bf16.msra.mxu1 %v1733_v53  ;;  %1300 = vmatpush1.bf16.msra.mxu0 %v1775_v54  ;;  %v671_v53 = vld [vmem:[%s2644_s3 + $0x58] sm:$0xff] }
 0x17d   : > { %1749 = vmatprep.subr.msk.bf16.mxu1 %vm860_vm0, %v1742_v55  ;;  %1791 = vmatprep.subr.msk.bf16.mxu0 %vm860_vm0, %v1784_v56 }
 0x180   : > { %933 = vmatpush1.bf16.msra.mxu1 %v868_v61  ;;  %1302 = vmatpush1.bf16.msra.mxu0 %v1202_v62  ;;  %v687_v61 = vld [vmem:[%s2644_s3 + $0xd8] sm:$0xff] }
 0x181   : > { %1008 = vmatprep.subr.bf16.mxu1 %v1722_v63  ;;  %1462 = vmatprep.subr.bf16.mxu0 %v2402_v17  ;;  %v2458_v17 = vcombine.high %v660_v13, %v664_v14  ;;  %v1786_v63 = vcombine.high %v687_v61, %v687_v61  ;;  %v1785_v0 = vcombine.low %v687_v61, %v687_v61 }
 0x183   : > { %1750 = vmatmul.mubr.msk.bf16.vlgmr.msra.gmra.mrb[4].mxu1 %vm856_vm1, %v2417_v40  ;;  %1792 = vmatmul.mubr.msk.bf16.vlgmr.msra.gmra.mrb[12].mxu0 %vm856_vm1, %v2417_v40  ;;  %v1208_v1 = vsel %vm860_vm0, %v1785_v0, 0 }
 0x184   : > { %1009 = vmatpush1.bf16.msra.mxu1 %v1721_v2  ;;  %1463 = vmatpush1.bf16.msra.mxu0 %v2400_v16  ;;  %v880_v16 = vsel %vm860_vm0, %v1745_v12, 0 }
 0x185   : > { %1010 = vmatprep.subr.bf16.mxu1 %v1730_v3  ;;  %1464 = vmatprep.subr.bf16.mxu0 %v1768_v42  ;;  %v681_v42 = vld [vmem:[%s2644_s3 + $0xa8] sm:$0xff] }
 0x186   : > { %1040 = vmatprep.mubr.bf16.mxu1 %v2149_v18  ;;  %1494 = vmatprep.mubr.bf16.mxu0 %v2149_v18  ;;  %v1774_v44 = vcombine.high %v677_v41, %v681_v42  ;;  %v1773_v46 = vcombine.low %v677_v41, %v681_v42 }
 0x188   : > { %1011 = vmatpush1.bf16.msra.mxu1 %v1729_v6  ;;  %1465 = vmatpush1.bf16.msra.mxu0 %v1767_v48  ;;  %v1781_v48 = vcombine.low %v685_v45, %v685_v45 }
 0x189   : > { %1012 = vmatprep.subr.bf16.mxu1 %v1738_v7  ;;  %1466 = vmatprep.subr.bf16.mxu0 %v1776_v50  ;;  %v667_v50 = vld [vmem:[%s2644_s3 + $0x38] sm:$0xff] }
 0x18a   : > { %v1196_v51 = vsel %vm860_vm0, %v1781_v48, 0  ;;  %v1762_v52 = vcombine.high %v663_v49, %v667_v50  ;;  %v1761_v55 = vcombine.low %v663_v49, %v667_v50 }
 0x18c   : > { %1013 = vmatpush1.bf16.msra.mxu1 %v1737_v9  ;;  %1467 = vmatpush1.bf16.msra.mxu0 %v1775_v54  ;;  %v675_v54 = vld [vmem:[%s2644_s3 + $0x78] sm:$0xff] }
 0x18d   : > { %1753 = vmatprep.subr.msk.bf16.mxu1 %vm860_vm0, %v1746_v11  ;;  %1799 = vmatprep.subr.msk.bf16.mxu0 %vm860_vm0, %v1784_v56  ;;  %v1770_v56 = vcombine.high %v671_v53, %v675_v54  ;;  %v1769_v59 = vcombine.low %v671_v53, %v675_v54 }
 0x190   : > { %1015 = vmatpush1.bf16.msra.mxu1 %v880_v16  ;;  %1469 = vmatpush1.bf16.msra.mxu0 %v1202_v62  ;;  %v1777_v62 = vcombine.low %v679_v57, %v683_v58 }
 0x191   : > { %1213 = vmatprep.subr.bf16.mxu1 %v2458_v17 }
 0x193   : > { %1754 = vmatmul.mubr.msk.bf16.vlgmr.msra.gmra.mrb[8].mxu1 %vm856_vm1, %v2417_v40  ;;  %1800 = vmatmul.mubr.msk.bf16.vlgmr.msra.gmra.mrb[12].mxu0 %vm856_vm1, %v2468_v22 }
 0x194   : > { %1214 = vmatpush1.bf16.msra.mxu1 %v2466_v21  ;;  %1245 = vmatprep.mubr.bf16.mxu1 %v2149_v18 }
 0x195   : > { %1215 = vmatprep.subr.bf16.mxu1 %v2471_v23 }
 0x198   : > { %1216 = vmatpush1.bf16.msra.mxu1 %v2484_v26 }
 0x199   : > { %1217 = vmatprep.subr.bf16.mxu1 %v2488_v27 }
 0x19c   : > { %1218 = vmatpush1.bf16.msra.mxu1 %v2494_v29 }
 0x19d   : > { %1787 = vmatprep.subr.msk.bf16.mxu1 %vm860_vm0, %v2497_v30 }
 0x1a0   : > { %1220 = vmatpush1.bf16.msra.mxu1 %v1190_v34 }
 0x1a1   : > { %1254 = vmatprep.subr.bf16.mxu1 %v1758_v35 }
 0x1a3   : > { %1788 = vmatmul.mubr.msk.bf16.vlgmr.msra.gmra.mrb[0].mxu1 %vm856_vm1, %v2417_v40 }
 0x1a4   : > { %1255 = vmatpush1.bf16.msra.mxu1 %v1757_v38  ;;  %1286 = vmatprep.mubr.bf16.mxu1 %v2149_v18 }
 0x1a5   : > { %1256 = vmatprep.subr.bf16.mxu1 %v1766_v39 }
 0x1a8   : > { %1257 = vmatpush1.bf16.msra.mxu1 %v1765_v43 }
 0x1a9   : > { %1258 = vmatprep.subr.bf16.mxu1 %v1774_v44 }
 0x1ac   : > { %1259 = vmatpush1.bf16.msra.mxu1 %v1773_v46 }
 0x1ad   : > { %1789 = vmatprep.subr.msk.bf16.mxu1 %vm860_vm0, %v1782_v47 }
 0x1b0   : > { %1261 = vmatpush1.bf16.msra.mxu1 %v1196_v51 }
 0x1b1   : > { %1336 = vmatprep.subr.bf16.mxu1 %v1762_v52 }
 0x1b3   : > { %1790 = vmatmul.mubr.msk.bf16.vlgmr.msra.gmra.mrb[4].mxu1 %vm856_vm1, %v2417_v40 }
 0x1b4   : > { %1337 = vmatpush1.bf16.msra.mxu1 %v1761_v55  ;;  %1368 = vmatprep.mubr.bf16.mxu1 %v2149_v18 }
 0x1b5   : > { %1338 = vmatprep.subr.bf16.mxu1 %v1770_v56 }
 0x1b8   : > { %1339 = vmatpush1.bf16.msra.mxu1 %v1769_v59 }
 0x1b9   : > { %1340 = vmatprep.subr.bf16.mxu1 %v1778_v60 }
 0x1bc   : > { %1341 = vmatpush1.bf16.msra.mxu1 %v1777_v62 }
 0x1bd   : > { %1793 = vmatprep.subr.msk.bf16.mxu1 %vm860_vm0, %v1786_v63 }
 0x1c0   : > { %1343 = vmatpush1.bf16.msra.mxu1 %v1208_v1 }
 0x1c1   : > { %1380 = vmatprep.subr.bf16.mxu1 %v2458_v17 }
 0x1c3   : > { %1794 = vmatmul.mubr.msk.bf16.vlgmr.msra.gmra.mrb[8].mxu1 %vm856_vm1, %v2417_v40 }
 0x1c4   : > { %1381 = vmatpush1.bf16.msra.mxu1 %v2466_v21  ;;  %1412 = vmatprep.mubr.bf16.mxu1 %v2149_v18 }
 0x1c5   : > { %1382 = vmatprep.subr.bf16.mxu1 %v2471_v23 }
 0x1c8   : > { %1383 = vmatpush1.bf16.msra.mxu1 %v2484_v26 }
 0x1c9   : > { %1384 = vmatprep.subr.bf16.mxu1 %v2488_v27 }
 0x1cc   : > { %1385 = vmatpush1.bf16.msra.mxu1 %v2494_v29 }
 0x1cd   : > { %1795 = vmatprep.subr.msk.bf16.mxu1 %vm860_vm0, %v2497_v30 }
 0x1d0   : > { %1387 = vmatpush1.bf16.msra.mxu1 %v1190_v34 }
 0x1d1   : > { %1421 = vmatprep.subr.bf16.mxu1 %v1758_v35 }
 0x1d3   : > { %1796 = vmatmul.mubr.msk.bf16.vlgmr.msra.gmra.mrb[0].mxu1 %vm856_vm1, %v2468_v22 }
 0x1d4   : > { %1422 = vmatpush1.bf16.msra.mxu1 %v1757_v38  ;;  %1453 = vmatprep.mubr.bf16.mxu1 %v2149_v18 }
 0x1d5   : > { %1423 = vmatprep.subr.bf16.mxu1 %v1766_v39 }
 0x1d8   : > { %1424 = vmatpush1.bf16.msra.mxu1 %v1765_v43 }
 0x1d9   : > { %1425 = vmatprep.subr.bf16.mxu1 %v1774_v44 }
 0x1dc   : > { %1426 = vmatpush1.bf16.msra.mxu1 %v1773_v46 }
 0x1dd   : > { %1797 = vmatprep.subr.msk.bf16.mxu1 %vm860_vm0, %v1782_v47 }
 0x1e0   : > { %1428 = vmatpush1.bf16.msra.mxu1 %v1196_v51 }
 0x1e1   : > { %1503 = vmatprep.subr.bf16.mxu1 %v1762_v52 }
 0x1e3   : > { %1798 = vmatmul.mubr.msk.bf16.vlgmr.msra.gmra.mrb[4].mxu1 %vm856_vm1, %v2468_v22 }
 0x1e4   : > { %1504 = vmatpush1.bf16.msra.mxu1 %v1761_v55  ;;  %1535 = vmatprep.mubr.bf16.mxu1 %v2149_v18 }
 0x1e5   : > { %1505 = vmatprep.subr.bf16.mxu1 %v1770_v56 }
 0x1e8   : > { %1506 = vmatpush1.bf16.msra.mxu1 %v1769_v59 }
 0x1e9   : > { %1507 = vmatprep.subr.bf16.mxu1 %v1778_v60 }
 0x1ec   : > { %1508 = vmatpush1.bf16.msra.mxu1 %v1777_v62 }
 0x1ed   : > { %1801 = vmatprep.subr.msk.bf16.mxu1 %vm860_vm0, %v1786_v63 }
 0x1f0   : > { %1510 = vmatpush1.bf16.msra.mxu1 %v1208_v1 }
 0x1f3   : > { %1802 = vmatmul.mubr.msk.bf16.vlgmr.msra.gmra.mrb[8].mxu1 %vm856_vm1, %v2468_v22 }
 0x266   : > { %v1496_v40 = vpop.f32.mrb[12].mxu0 }
 0x267   : > { %1807 = vst [vmem:[%s2319_s12 + $0x30] sm:$0xff] %v1496_v40  ;;  %v1498_v2 = vpop.f32.mrb[13].mxu0 }
 0x268   : > { %1808 = vst [vmem:[%s2319_s12 + $0x38] sm:$0xff] %v1498_v2  ;;  %v1500_v18 = vpop.f32.mrb[14].mxu0 }
 0x269   : > { %v1501_v3 = vpop.f32.mrb[15].mxu0 }
 0x2a6   : > { %v1414_v4 = vpop.f32.mrb[0].mxu1 }
 0x2a7   : > { %1803 = vst [vmem:[%s2319_s12 + $0x10] sm:$0xff] %v1414_v4  ;;  %v1416_v5 = vpop.f32.mrb[1].mxu1 }
 0x2a8   : > { %1804 = vst [vmem:[%s2319_s12 + $0x18] sm:$0xff] %v1416_v5  ;;  %v1418_v6 = vpop.f32.mrb[2].mxu1 }
 0x2a9   : > { %v1419_v7 = vpop.f32.mrb[3].mxu1 }
 0x2b6   : > { %v1455_v8 = vpop.f32.mrb[4].mxu1 }
 0x2b7   : > { %1805 = vst [vmem:[%s2319_s12 + $0x20] sm:$0xff] %v1455_v8  ;;  %v1457_v9 = vpop.f32.mrb[5].mxu1 }
 0x2b8   : > { %1806 = vst [vmem:[%s2319_s12 + $0x28] sm:$0xff] %v1457_v9  ;;  %v1459_v10 = vpop.f32.mrb[6].mxu1 }
 0x2b9   : > { %v1460_v11 = vpop.f32.mrb[7].mxu1 }
 0x2c6   : > { %v1537_v12 = vpop.f32.mrb[8].mxu1 }
 0x2c7   : > { %1809 = vst [vmem:[%s2319_s12 + $0x40] sm:$0xff] %v1537_v12  ;;  %v1539_v13 = vpop.f32.mrb[9].mxu1 }
 0x2c8   : > { %1810 = vst [vmem:[%s2319_s12 + $0x48] sm:$0xff] %v1539_v13  ;;  %v1541_v14 = vpop.f32.mrb[10].mxu1 }
 0x2c9   : > { %v1542_v15 = vpop.f32.mrb[11].mxu1 }
 0x2ca   : > { %2075 = shalt.err (!%p2072_p6)
}
 0x2cb   : > { %s2076_s13 = scalar_lea.hbm %s2587_s25, 1280  ;;  %s2080_s10 = scalar_lea.hbm %s2646_s5, 2560 }
 0x2cc   : > { %p2077_p7 = scmp.ne.s32.totalorder %s2587_s25, %s2076_s13  ;;  %p2081_p0 = scmp.lt.u32.totalorder %s2587_s25, %s2646_s5 }
 0x2cd   : > { %p2082_p2 = scmp.lt.u32.totalorder %s2080_s10, %s2076_s13  ;;  %p2084_p8 = scmp.lt.u32.totalorder %s2076_s13, %s2587_s25 }
 0x2ce   : > { %p2078_p9 = pnand %p2077_p7, %p2658_p10 }
 0x2cf   : > { %p2083_p4 = por %p2082_p2, %p2081_p0 }
 0x2d0   : > { %p2079_p12 = pneg %p2078_p9 }
 0x2d1   : > { %p2085_p11 = por %p2084_p8, %p2083_p4 }
 0x2d3   : > { %p2086_p13 = pnand %p2085_p11, %p2079_p12 }
 0x2d5   : > { %2089 = shalt.err (!%p2086_p13)
}
 0x2d6   : > { %s2151_s17 = smov 256   ;;  %s2152_s27 = smov 16  }
 0x2d7   : > { %1919 = dma.vmem_to_hbm [thread:$0]  (%p2658_p10), %s2589_s24, 1280, %s2587_s25, %s2595_s9, %s2151_s17, %s2151_s17, %s2152_s27  }
 0x2d8 PF: > { %p1931_p1 = scmp.ge.s32.totalorder %s2144_s23, 2  ;;  %s1595_s29 = sand.u32 1, %s2124_s18  }
 0x2d9   : > { %p2659_p3 = scmp.ne.s32.totalorder %s2652_s30, 0  ;;  %s1596_s21 = scalar_lea.sflag [#allocation4], %s1595_s29 }
 0x2db   : > { %p1926_p5 = pnand %p1931_p1, %p2659_p3 }
 0x2dd   : > { %2119 = dma.done.wait (!%p1926_p5), %s1596_s21, 1280  }
 0x2de   : > { %2121 = vsyncadd (!%p1926_p5), %s1596_s21, 4294966016  ;;  %s19_s23 = sadd.s32 1, %s2144_s23   ;;  %s2660_s18 = smov %s2128_s19 }
 0x2df   : > { %p16_p6 = scmp.ge.s32.totalorder %s19_s23, 4   ;;  %s2661_s19 = smov %s2132_s20 }
 0x2e0   : > { %s2662_s20 = smov %s2236_s6  ;;  %s2663_s21 = smov %s2140_s22 }
 0x2e1   : > { %s2664_s22 = smov %s2666_s26  ;;  %18 = sbr.rel (!%p16_p6) target bundleno = 5 (0x5), region = 84 }
 0x2e8   :  { %1601 = vsyncpa [#allocation3], 1 }
 0x2e9   :  { %1603 = vsyncpa [#allocation3 + $0x1], 1 }
 0x2ea   :  { %1604 = vsyncpa [#allocation4], 1 }
 0x2eb   :  { %1606 = vsyncpa [#allocation4 + $0x1], 1 }

// kernel: tpu_custom_call.1
= control target key start
LH: loop header
LB: loop body
LE: loop exit
PB: predicated region body
PF: predicated region fallthrough
CT: control target
= control target key end

     0   :  { %10 = vsyncpa [#allocation3], 0  ;;  %s2641_s0 = inlined_call_operand.vmem [shape: f32[2,8,256], index: 0, kind: input, shape index: {}]   ;;  %s2642_s1 = inlined_call_operand.vmem [shape: bf16[256,56], index: 1, kind: input, shape index: {}]   ;;  %s2643_s2 = inlined_call_operand.vmem [shape: bf16[256,56], index: 2, kind: input, shape index: {}]   ;;  %s2644_s3 = inlined_call_operand.vmem [shape: bf16[56,1024], index: 3, kind: input, shape index: {}]   ;;  %s2645_s4 = inlined_call_operand.hbm [shape: bf16[56,1024], index: 4, kind: input, shape index: {}]   ;;  %s2646_s5 = inlined_call_operand.hbm [shape: f32[2,5,8,256], index: 5, kind: output, shape index: {}]  }
   0x1   :  { %11 = vsyncpa [#allocation4], 0 }
   0x2   :  { %13 = vsyncpa [#allocation4 + $0x1], 0  ;;  %s2183_s18 = smov 0   ;;  %s2185_s19 = smov 0  }
   0x3   :  { %s2187_s20 = smov 0   ;;  %s2189_s21 = smov 0  }
   0x4   :  { %s2191_s22 = smov 0   ;;  %s2193_s23 = smov 0  }
   0x5 LB: > { %s1674_s24 = sadd.s32 4294967295, %s2144_s23   ;;  %s1675_s25 = sadd.s32 4294967294, %s2144_s23   ;;  %s2144_s23 = sphi %s2193_s23, %s19_s23   ;;  %s2140_s22 = sphi %s2191_s22, %s2664_s22   ;;  %s2136_s21 = sphi %s2189_s21, %s2663_s21   ;;  %s2132_s20 = sphi %s2187_s20, %s2662_s20   ;;  %s2128_s19 = sphi %s2185_s19, %s2661_s19   ;;  %s2124_s18 = sphi %s2183_s18, %s2660_s18  }
   0x6   : > { %s31_s26 = sadd.s32 1, %s2140_s22  ;;  %s152_s27 = sadd.s32 1, %s2132_s20 }
   0x7   : > { %p33_p0 = scmp.ge.s32.totalorder %s31_s26, 2  ;;  %p162_p1 = scmp.ne.s32.totalorder %s2132_s20, %s2128_s19 }
   0x8   : > { %p163_p2 = scmp.eq.s32.totalorder %s1674_s24, 1  ;;  %p168_p3 = scmp.ne.s32.totalorder %s2128_s19, %s2124_s18 }
   0x9   : > { %s2666_s26 = smov (%p33_p0, %s31_s26), 0  ;;  %p169_p5 = scmp.eq.s32.totalorder %s1675_s25, 1 }
   0xa   : > { %p2223_p4 = por %p163_p2, %p162_p1  ;;  %s147_s29 = ssub.s32 %s2140_s22, %s2666_s26 }
   0xb   : > { %p1676_p6 = scmp.ge.s32.totalorder %s2144_s23, 1  ;;  %p150_p7 = scmp.eq.s32.totalorder %s147_s29, 0 }
   0xc   : > { %s2651_s28 = scalar_select %p2223_p4, 1, 0 }
   0xd   : > { %p2230_p8 = por %p169_p5, %p168_p3  ;;  %p176_p9 = scmp.lt.s32.totalorder %s2144_s23, 3 }
   0xe   : > { %s2236_s6 = scalar_select %p150_p7, %s2132_s20, %s152_s27  }
   0xf   : > { %s2652_s30 = scalar_select %p2230_p8, 1, 0 }
  0x10   : > { %p2238_p10 = pnand %p1676_p6, %p176_p9  ;;  %p2242_p11 = scmp.eq.s32.totalorder %s1674_s24, 0 }
  0x11   : > { %s2146_s9 = smov [#allocation2]   ;;  %s2034_s14 = scalar_lea.hbm %s2645_s4, 3584 }
  0x12   : > { %s2653_s7 = scalar_select %p2238_p10, 1, 0 }
  0x13   : > { %s2654_s8 = scalar_select %p2242_p11, 1, 0 }
  0x14   : > { %p1921_p12 = pneg %p2238_p10  ;;  %s197_s10 = sshll.u32 %s2146_s9, 4  ;;  %s198_s10 = int_to_ptr.vmem [resolvable:$true] %s197_s10 }
  0x15   : > { %p2035_p0 = scmp.ne.s32.totalorder %s2645_s4, %s2034_s14  ;;  %p2041_p5 = scmp.lt.u32.totalorder %s2034_s14, %s2645_s4 }
  0x16   : > { %p2250_p13 = pnand %p2242_p11, %p1921_p12 }
  0x18   : > { %p2036_p1 = pneg %p2250_p13 }
  0x1a   : > { %p2037_p2 = pnand %p2036_p1, %p2035_p0 }
  0x1c   : > { %p2038_p3 = pneg %p2037_p2 }
  0x1e   : > { %p2043_p6 = pnand %p2041_p5, %p2038_p3 }
  0x20   : > { %2046 = shalt.err (!%p2043_p6)
}
  0x21   : > { %s2047_s25 = scalar_lea.vmem %s198_s10, 3584  ;;  %p2055_p8 = scmp.lt.s32.totalorder %s198_s10, %s198_s10 }
  0x22   : > { %p2048_p7 = scmp.ne.s32.totalorder %s198_s10, %s2047_s25  ;;  %p2056_p4 = scmp.lt.s32.totalorder %s2047_s25, %s2047_s25 }
  0x24   : > { %p2050_p9 = pnand %p2048_p7, %p2036_p1  ;;  %p2057_p11 = por %p2056_p4, %p2055_p8 }
  0x26   : > { %p2051_p12 = pneg %p2050_p9 }
  0x28   : > { %p2058_p10 = pnand %p2057_p11, %p2051_p12 }
  0x2a   : > { %2061 = shalt.err (!%p2058_p10)
}
  0x2b   : > { %s2147_s27 = smov 512   ;;  %s2148_s29 = smov 32  }
  0x2c   : > { %1924 = dma.hbm_to_vmem [thread:$0]  (!%p2250_p13), %s2645_s4, 3584, %s198_s10, [#allocation3], %s2147_s27, %s2147_s27, %s2148_s29  }
  0x2d   : > { %p2656_p0 = scmp.ne.s32.totalorder %s2653_s7, 0 }
  0x2e   : > { %p2657_p2 = scmp.ne.s32.totalorder (!%p2656_p0), %s2654_s8, 0 }
  0x2f   : > { %225 = sbr.rel (%p2656_p0) target bundleno = 728 (0x2d8), region = 40 }
  0x36   : > { %2115 = dma.done.wait (%p2657_p2), [#allocation3], 3584  }
  0x37   : > { %2117 = vsyncadd (%p2657_p2), [#allocation3], 4294963712  ;;  %v1986_v0 = vld [vmem:[%s2643_s2 + $0x40] sm:$0xff]   ;;  %v1988_v2 = vld [vmem:[%s2643_s2 + $0x48] sm:$0xff]   ;;  %p257_p4 = scmp.lt.s32.totalorder %s2136_s21, 1  ;;  %s254_s13 = sand.u32 1, %s2128_s19  }
  0x38   : > { %v1987_v1 = vld [vmem:[%s2643_s2] sm:$0xff]   ;;  %1815 = vmatprep.subr.bf16.mxu0 %v1986_v0  ;;  %v1989_v3 = vld [vmem:[%s2643_s2 + $0x8] sm:$0xff]   ;;  %v1990_v4 = vld [vmem:[%s2643_s2 + $0x50] sm:$0xff]   ;;  %s1913_s8 = smul.u32 80, %s254_s13  ;;  %vm860_vm0 = vcmask 1043456   ;;  %vm856_vm1 = vcmask 457728  }
  0x39   : > { %1816 = vmatpush3.bf16.msra.mxu0 %v1987_v1  ;;  %s258_s25 = scalar_select %p257_p4, %s2136_s21, 1  ;;  %v1991_v5 = vld [vmem:[%s2643_s2 + $0x10] sm:$0xff]   ;;  %v1992_v6 = vld [vmem:[%s2643_s2 + $0x58] sm:$0xff]   ;;  %v1994_v8 = vld [vmem:[%s2643_s2 + $0x60] sm:$0xff]  }
  0x3a   : > { %1817 = vmatprep.subr.bf16.mxu0 %v1988_v2  ;;  %v1993_v7 = vld [vmem:[%s2643_s2 + $0x18] sm:$0xff]   ;;  %v1995_v9 = vld [vmem:[%s2643_s2 + $0x20] sm:$0xff]   ;;  %v1996_v10 = vld [vmem:[%s2643_s2 + $0x68] sm:$0xff]   ;;  %s2319_s12 = scalar_lea.vmem [#allocation5], %s1913_s8  ;;  %s1914_s17 = smul.u32 1280, %s2136_s21 }
  0x3b   : > { %s1814_s14 = sshll.u32 %s258_s25, 4  ;;  %v1997_v14 = vld [vmem:[%s2643_s2 + $0x28] sm:$0xff]   ;;  %v1998_v15 = vld [vmem:[%s2643_s2 + $0x70] sm:$0xff]   ;;  %v2000_v17 = vld [vmem:[%s2643_s2 + $0x78] sm:$0xff]   ;;  %s2595_s9 = scalar_lea.sflag [#allocation4], %s254_s13 }
  0x3c   : > { %s265_s24 = scalar_lea.vmem %s2641_s0, %s1814_s14  ;;  %v1999_v16 = vld [vmem:[%s2643_s2 + $0x30] sm:$0xff]   ;;  %v2001_v18 = vld [vmem:[%s2643_s2 + $0x38] sm:$0xff]   ;;  %v2002_v19 = vld [vmem:[%s2642_s1 + $0x40] sm:$0xff]   ;;  %s2587_s25 = scalar_lea.hbm %s2646_s5, %s1914_s17 }
  0x3d   : > { %1818 = vmatpush3.bf16.msra.mxu0 %v1989_v3  ;;  %v268_v11 = vld [vmem:[%s265_s24 + $0x8] sm:$0xff]  ;;  %v2317_v12 = vld [vmem:[%s265_s24] sm:$0xff]  ;;  %v2006_v24 = vld [vmem:[%s2642_s1 + $0x50] sm:$0xff]   ;;  %s1580_s24 = sshll.u32 %s2319_s12, 4  ;;  %p2658_p10 = scmp.ne.s32.totalorder %s2651_s28, 0  ;;  %s2589_s24 = int_to_ptr.vmem [resolvable:$true] %s1580_s24 }
  0x3e   : > { %1819 = vmatprep.subr.bf16.mxu0 %v1990_v4  ;;  %270 = vst [vmem:[%s2319_s12 + $0x8] sm:$0xff] %v268_v11  ;;  %v272_v13 = vpack.c.bf16 %v268_v11, %v268_v11  ;;  %269 = vst [vmem:[%s2319_s12] sm:$0xff] %v2317_v12  ;;  %v271_v20 = vpack.c.bf16 %v2317_v12, %v2317_v12  ;;  %v2003_v21 = vld [vmem:[%s2642_s1] sm:$0xff]   ;;  %v2004_v22 = vld [vmem:[%s2642_s1 + $0x48] sm:$0xff]   ;;  %s2062_s21 = scalar_lea.vmem %s2589_s24, 1280  ;;  %s2150_s14 = smov [#allocation5]  }
  0x3f   : > { %v2005_v23 = vld [vmem:[%s2642_s1 + $0x8] sm:$0xff]   ;;  %v2007_v25 = vld [vmem:[%s2642_s1 + $0x10] sm:$0xff]   ;;  %v2008_v26 = vld [vmem:[%s2642_s1 + $0x58] sm:$0xff]   ;;  %p2063_p8 = scmp.ne.s32.totalorder %s2589_s24, %s2062_s21  ;;  %s2066_s11 = sshll.u32 %s2150_s14, 4  ;;  %s2067_s11 = int_to_ptr.vmem [resolvable:$false] %s2066_s11 }
  0x40   : > { %471 = vmatprep.mubr.bf16.mxu0 %v272_v13  ;;  %v2009_v27 = vld [vmem:[%s2642_s1 + $0x18] sm:$0xff]   ;;  %v2010_v28 = vld [vmem:[%s2642_s1 + $0x60] sm:$0xff]   ;;  %v2012_v30 = vld [vmem:[%s2642_s1 + $0x68] sm:$0xff]   ;;  %v274_v34 = vunpack.c.l.bf16 %v272_v13  ;;  %v273_v39 = vunpack.c.l.bf16 %v271_v20  ;;  %s2068_s15 = scalar_lea.vmem %s2067_s11, 2560  ;;  %p2069_p1 = scmp.lt.s32.totalorder %s2589_s24, %s2067_s11 }
  0x41   : > { %1820 = vmatpush3.bf16.msra.mxu0 %v1991_v5  ;;  %v2011_v29 = vld [vmem:[%s2642_s1 + $0x20] sm:$0xff]   ;;  %v2013_v31 = vld [vmem:[%s2642_s1 + $0x28] sm:$0xff]   ;;  %v2014_v32 = vld [vmem:[%s2642_s1 + $0x70] sm:$0xff]   ;;  %p2064_p11 = pnand %p2063_p8, %p2658_p10  ;;  %p2070_p3 = scmp.lt.s32.totalorder %s2068_s15, %s2062_s21 }
  0x42   : > { %1821 = vmatprep.subr.bf16.mxu0 %v1992_v6  ;;  %v2015_v33 = vld [vmem:[%s2642_s1 + $0x30] sm:$0xff]   ;;  %v2016_v35 = vld [vmem:[%s2642_s1 + $0x78] sm:$0xff]   ;;  %v276_v37 = vsub.f32 %v268_v11, %v274_v34  ;;  %v275_v40 = vsub.f32 %v2317_v12, %v273_v39  ;;  %v688_v42 = vld [vmem:[#allocation2] sm:$0xff] }
  0x43   : > { %v2017_v36 = vld [vmem:[%s2642_s1 + $0x38] sm:$0xff]   ;;  %v692_v43 = vld [vmem:[#allocation2 + $0x20] sm:$0xff]  ;;  %v690_v44 = vld [vmem:[#allocation2 + $0x10] sm:$0xff]  ;;  %p2065_p13 = pneg %p2064_p11  ;;  %p2071_p5 = por %p2070_p3, %p2069_p1 }
  0x44   : > { %v278_v38 = vpack.c.bf16 %v276_v37, %v276_v37  ;;  %v277_v41 = vpack.c.bf16 %v275_v40, %v275_v40  ;;  %v1716_v45 = vcombine.high %v688_v42, %v692_v43  ;;  %v694_v46 = vld [vmem:[#allocation2 + $0x30] sm:$0xff]  ;;  %v1715_v47 = vcombine.low %v688_v42, %v692_v43  ;;  %v696_v48 = vld [vmem:[#allocation2 + $0x40] sm:$0xff]  ;;  %v693_v11 = vld [vmem:[#allocation2 + $0x28] sm:$0xff] }
  0x45   : > { %1822 = vmatpush3.bf16.msra.mxu0 %v1993_v7  ;;  %v700_v49 = vld [vmem:[#allocation2 + $0x60] sm:$0xff]  ;;  %v1719_v50 = vcombine.low %v690_v44, %v694_v46  ;;  %v1720_v51 = vcombine.high %v690_v44, %v694_v46  ;;  %v698_v53 = vld [vmem:[#allocation2 + $0x50] sm:$0xff]  ;;  %v697_v34 = vld [vmem:[#allocation2 + $0x48] sm:$0xff]  ;;  %p2072_p6 = pnand %p2071_p5, %p2065_p13 }
  0x46   : > { %1823 = vmatprep.subr.bf16.mxu0 %v1994_v8  ;;  %v1724_v52 = vcombine.high %v696_v48, %v700_v49  ;;  %v702_v54 = vld [vmem:[#allocation2 + $0x70] sm:$0xff]  ;;  %v704_v55 = vld [vmem:[#allocation2 + $0x80] sm:$0xff]  ;;  %885 = vmatprep.subr.bf16.mxu1 %v1716_v45  ;;  %v1723_v60 = vcombine.low %v696_v48, %v700_v49  ;;  %v705_v43 = vld [vmem:[#allocation2 + $0x88] sm:$0xff] }
  0x47   : > { %v1728_v56 = vcombine.high %v698_v53, %v702_v54  ;;  %v708_v57 = vld [vmem:[#allocation2 + $0xa0] sm:$0xff]  ;;  %v706_v58 = vld [vmem:[#allocation2 + $0x90] sm:$0xff]  ;;  %886 = vmatpush1.bf16.msra.mxu1 %v1715_v47  ;;  %v1727_v61 = vcombine.low %v698_v53, %v702_v54  ;;  %v709_v44 = vld [vmem:[#allocation2 + $0xa8] sm:$0xff] }
  0x48   : > { %v710_v59 = vld [vmem:[#allocation2 + $0xb0] sm:$0xff]  ;;  %887 = vmatprep.subr.bf16.mxu1 %v1724_v52  ;;  %v1732_v62 = vcombine.high %v704_v55, %v708_v57  ;;  %v1731_v1 = vcombine.low %v704_v55, %v708_v57  ;;  %v712_v2 = vld [vmem:[#allocation2 + $0xc0] sm:$0xff]  ;;  %v1734_v49 = vcombine.high %v705_v43, %v709_v44  ;;  %v1733_v53 = vcombine.low %v705_v43, %v709_v44 }
  0x49   : > { %1824 = vmatpush3.bf16.msra.mxu0 %v1995_v9  ;;  %v1736_v63 = vcombine.high %v706_v58, %v710_v59  ;;  %v1735_v0 = vcombine.low %v706_v58, %v710_v59  ;;  %v714_v3 = vld [vmem:[#allocation2 + $0xd0] sm:$0xff]  ;;  %v1740_v4 = vcombine.high %v712_v2, %v712_v2  ;;  %v1739_v6 = vcombine.low %v712_v2, %v712_v2  ;;  %v691_v59 = vld [vmem:[#allocation2 + $0x18] sm:$0xff] }
  0x4a   : > { %1825 = vmatprep.subr.bf16.mxu0 %v1996_v10  ;;  %v1744_v5 = vcombine.high %v714_v3, %v714_v3  ;;  %v1743_v7 = vcombine.low %v714_v3, %v714_v3  ;;  %v689_v10 = vld [vmem:[#allocation2 + $0x8] sm:$0xff]  ;;  %v662_v12 = vld [vmem:[%s2644_s3 + $0x10] sm:$0xff] }
  0x4b   : > { %888 = vmatpush1.bf16.msra.mxu1 %v1723_v60  ;;  %v862_v8 = vsel %vm860_vm0, %v1739_v6, 0  ;;  %v670_v37 = vld [vmem:[%s2644_s3 + $0x50] sm:$0xff]  ;;  %v695_v60 = vld [vmem:[#allocation2 + $0x38] sm:$0xff] }
  0x4c   : > { %889 = vmatprep.subr.bf16.mxu1 %v1732_v62  ;;  %v874_v9 = vsel %vm860_vm0, %v1743_v7, 0  ;;  %v678_v45 = vld [vmem:[%s2644_s3 + $0x90] sm:$0xff]  ;;  %v1721_v2 = vcombine.low %v691_v59, %v695_v60 }
  0x4d   : > { %1826 = vmatpush3.bf16.msra.mxu0 %v1997_v14  ;;  %v666_v14 = vld [vmem:[%s2644_s3 + $0x30] sm:$0xff] }
  0x4e   : > { %1827 = vmatprep.subr.bf16.mxu0 %v1998_v15  ;;  %v1717_v15 = vcombine.low %v689_v10, %v693_v11  ;;  %v682_v46 = vld [vmem:[%s2644_s3 + $0xb0] sm:$0xff] }
  0x4f   : > { %890 = vmatpush1.bf16.msra.mxu1 %v1731_v1  ;;  %v686_v52 = vld [vmem:[%s2644_s3 + $0xd0] sm:$0xff]  ;;  %v1775_v54 = vcombine.low %v678_v45, %v682_v46  ;;  %v703_v1 = vld [vmem:[#allocation2 + $0x78] sm:$0xff] }
  0x50   : > { %1747 = vmatprep.subr.msk.bf16.mxu1 %vm860_vm0, %v1740_v4  ;;  %v1783_v58 = vcombine.low %v686_v52, %v686_v52  ;;  %v707_v4 = vld [vmem:[#allocation2 + $0x98] sm:$0xff] }
  0x51   : > { %1828 = vmatpush3.bf16.msra.mxu0 %v1999_v16  ;;  %v2400_v16 = vcombine.low %v662_v12, %v666_v14 }
  0x52   : > { %1829 = vmatprep.subr.bf16.mxu0 %v2000_v17  ;;  %v2402_v17 = vcombine.high %v662_v12, %v666_v14  ;;  %v1202_v62 = vsel %vm860_vm0, %v1783_v58, 0  ;;  %v664_v14 = vld [vmem:[%s2644_s3 + $0x20] sm:$0xff]  ;;  %v683_v58 = vld [vmem:[%s2644_s3 + $0xb8] sm:$0xff] }
  0x53   : > { %892 = vmatpush1.bf16.msra.mxu1 %v862_v8  ;;  %v715_v8 = vld [vmem:[#allocation2 + $0xd8] sm:$0xff] }
  0x54   : > { %v1745_v12 = vcombine.low %v715_v8, %v715_v8 }
  0x55   : > { %1830 = vmatpush3.bf16.msra.mxu0 %v2001_v18  ;;  %v2149_v18 = vmov 0  }
  0x56   : > { %1837 = vmatprep.subr.bf16.mxu0 %v2002_v19  ;;  %917 = vmatprep.mubr.bf16.mxu1 %v2149_v18 }
  0x58   : > { %472 = vmatmul.mubr.bf16.vlgmr.msra.gmra.mrb[0].mxu0 %v271_v20 }
  0x59   : > { %1838 = vmatpush3.bf16.msra.mxu0 %v2003_v21  ;;  %607 = vmatprep.mubr.bf16.mxu0 %v272_v13  ;;  %v1718_v13 = vcombine.high %v689_v10, %v693_v11  ;;  %v1746_v11 = vcombine.high %v715_v8, %v715_v8 }
  0x5a   : > { %1839 = vmatprep.subr.bf16.mxu0 %v2004_v22 }
  0x5b   : > { %926 = vmatprep.subr.bf16.mxu1 %v1718_v13  ;;  %v660_v13 = vld [vmem:[%s2644_s3] sm:$0xff] }
  0x5d   : > { %1840 = vmatpush3.bf16.msra.mxu0 %v2005_v23 }
  0x5e   : > { %1841 = vmatprep.subr.bf16.mxu0 %v2006_v24 }
  0x61   : > { %1842 = vmatpush3.bf16.msra.mxu0 %v2007_v25 }
  0x62   : > { %1843 = vmatprep.subr.bf16.mxu0 %v2008_v26 }
  0x65   : > { %1844 = vmatpush3.bf16.msra.mxu0 %v2009_v27 }
  0x66   : > { %1845 = vmatprep.subr.bf16.mxu0 %v2010_v28 }
  0x69   : > { %1846 = vmatpush3.bf16.msra.mxu0 %v2011_v29 }
  0x6a   : > { %1847 = vmatprep.subr.bf16.mxu0 %v2012_v30 }
  0x6d   : > { %1848 = vmatpush3.bf16.msra.mxu0 %v2013_v31 }
  0x6e   : > { %1849 = vmatprep.subr.bf16.mxu0 %v2014_v32 }
  0x71   : > { %1850 = vmatpush3.bf16.msra.mxu0 %v2015_v33 }
  0x72   : > { %1851 = vmatprep.subr.bf16.mxu0 %v2016_v35 }
  0x75   : > { %1852 = vmatpush3.bf16.msra.mxu0 %v2017_v36 }
  0x76   : > { %1859 = vmatprep.subr.bf16.mxu0 %v2002_v19 }
  0x78   : > { %608 = vmatmul.mubr.bf16.vlgmr.msra.gmra.mrb[4].mxu0 %v271_v20 }
  0x79   : > { %1860 = vmatpush3.bf16.msra.mxu0 %v2003_v21  ;;  %647 = vmatprep.mubr.bf16.mxu0 %v278_v38  ;;  %v674_v38 = vld [vmem:[%s2644_s3 + $0x70] sm:$0xff] }
  0x7a   : > { %1861 = vmatprep.subr.bf16.mxu0 %v2004_v22  ;;  %v1768_v42 = vcombine.high %v670_v37, %v674_v38  ;;  %v1767_v48 = vcombine.low %v670_v37, %v674_v38  ;;  %v673_v37 = vld [vmem:[%s2644_s3 + $0x68] sm:$0xff] }
  0x7d   : > { %1862 = vmatpush3.bf16.msra.mxu0 %v2005_v23 }
  0x7e   : > { %1863 = vmatprep.subr.bf16.mxu0 %v2006_v24 }
  0x81   : > { %1864 = vmatpush3.bf16.msra.mxu0 %v2007_v25 }
  0x82   : > { %1865 = vmatprep.subr.bf16.mxu0 %v2008_v26 }
  0x85   : > { %1866 = vmatpush3.bf16.msra.mxu0 %v2009_v27 }
  0x86   : > { %1867 = vmatprep.subr.bf16.mxu0 %v2010_v28 }
  0x89   : > { %1868 = vmatpush3.bf16.msra.mxu0 %v2011_v29 }
  0x8a   : > { %1869 = vmatprep.subr.bf16.mxu0 %v2012_v30 }
  0x8d   : > { %1870 = vmatpush3.bf16.msra.mxu0 %v2013_v31 }
  0x8e   : > { %1871 = vmatprep.subr.bf16.mxu0 %v2014_v32 }
  0x91   : > { %1872 = vmatpush3.bf16.msra.mxu0 %v2015_v33 }
  0x92   : > { %1873 = vmatprep.subr.bf16.mxu0 %v2016_v35 }
  0x95   : > { %1874 = vmatpush3.bf16.msra.mxu0 %v2017_v36  ;;  %v701_v36 = vld [vmem:[#allocation2 + $0x68] sm:$0xff] }
  0x96   : > { %967 = vmatprep.subr.bf16.mxu0 %v1720_v51  ;;  %v1725_v47 = vcombine.low %v697_v34, %v701_v36  ;;  %v713_v51 = vld [vmem:[#allocation2 + $0xc8] sm:$0xff] }
  0x97   : > { %v1742_v55 = vcombine.high %v713_v51, %v713_v51  ;;  %v1741_v57 = vcombine.low %v713_v51, %v713_v51 }
  0x98   : > { %648 = vmatmul.mubr.bf16.vlgmr.msra.gmra.mrb[8].mxu0 %v277_v41  ;;  %v1726_v41 = vcombine.high %v697_v34, %v701_v36  ;;  %v669_v36 = vld [vmem:[%s2644_s3 + $0x48] sm:$0xff] }
  0x99   : > { %968 = vmatpush1.bf16.msra.mxu0 %v1719_v50  ;;  %999 = vmatprep.mubr.bf16.mxu0 %v2149_v18  ;;  %v1776_v50 = vcombine.high %v678_v45, %v682_v46  ;;  %v1765_v43 = vcombine.low %v669_v36, %v673_v37  ;;  %v685_v45 = vld [vmem:[%s2644_s3 + $0xc8] sm:$0xff] }
  0x9a   : > { %969 = vmatprep.subr.bf16.mxu0 %v1728_v56  ;;  %v1784_v56 = vcombine.high %v686_v52, %v686_v52 }
  0x9d   : > { %970 = vmatpush1.bf16.msra.mxu0 %v1727_v61  ;;  %v868_v61 = vsel %vm860_vm0, %v1741_v57, 0  ;;  %v679_v57 = vld [vmem:[%s2644_s3 + $0x98] sm:$0xff] }
  0x9e   : > { %971 = vmatprep.subr.bf16.mxu0 %v1736_v63  ;;  %v1722_v63 = vcombine.high %v691_v59, %v695_v60  ;;  %v1778_v60 = vcombine.high %v679_v57, %v683_v58 }
  0xa1   : > { %972 = vmatpush1.bf16.msra.mxu0 %v1735_v0  ;;  %v699_v0 = vld [vmem:[#allocation2 + $0x58] sm:$0xff] }
  0xa2   : > { %1751 = vmatprep.subr.msk.bf16.mxu0 %vm860_vm0, %v1744_v5  ;;  %v1730_v3 = vcombine.high %v699_v0, %v703_v1  ;;  %v711_v5 = vld [vmem:[#allocation2 + $0xb8] sm:$0xff]  ;;  %v1729_v6 = vcombine.low %v699_v0, %v703_v1 }
  0xa3   : > { %v1738_v7 = vcombine.high %v707_v4, %v711_v5 }
  0xa5   : > { %974 = vmatpush1.bf16.msra.mxu0 %v874_v9  ;;  %v1737_v9 = vcombine.low %v707_v4, %v711_v5 }
  0xa6   : > { %1295 = vmatprep.subr.bf16.mxu0 %v2402_v17 }
 0x12b   : > { %v1831_v19 = vpop.f32.mrb[0].mxu0 }
 0x12c   : > { %v1832_v20 = vpop.f32.mrb[1].mxu0 }
 0x12d   : > { %v1833_v21 = vadd.f32 %v1832_v20, %v1831_v19  ;;  %v1834_v22 = vpop.f32.mrb[2].mxu0  ;;  %v668_v19 = vld [vmem:[%s2644_s3 + $0x40] sm:$0xff] }
 0x12e   : > { %v1835_v23 = vpop.f32.mrb[3].mxu0  ;;  %v672_v20 = vld [vmem:[%s2644_s3 + $0x60] sm:$0xff] }
 0x12f   : > { %v2471_v23 = vcombine.high %v668_v19, %v672_v20 }
 0x14b   : > { %v1853_v24 = vpop.f32.mrb[4].mxu0 }
 0x14c   : > { %v1854_v25 = vpop.f32.mrb[5].mxu0 }
 0x14d   : > { %v1855_v26 = vadd.f32 %v1854_v25, %v1853_v24  ;;  %v1856_v27 = vpop.f32.mrb[6].mxu0  ;;  %v676_v24 = vld [vmem:[%s2644_s3 + $0x80] sm:$0xff] }
 0x14e   : > { %v1857_v28 = vpop.f32.mrb[7].mxu0  ;;  %v680_v25 = vld [vmem:[%s2644_s3 + $0xa0] sm:$0xff] }
 0x14f   : > { %v610_v29 = vadd.f32 %v1855_v26, %v1833_v21  ;;  %v2466_v21 = vcombine.low %v660_v13, %v664_v14  ;;  %v2484_v26 = vcombine.low %v668_v19, %v672_v20  ;;  %v2488_v27 = vcombine.high %v676_v24, %v680_v25  ;;  %v684_v28 = vld [vmem:[%s2644_s3 + $0xc0] sm:$0xff] }
 0x16b   : > { %v1875_v30 = vpop.f32.mrb[8].mxu0 }
 0x16c   : > { %v1876_v31 = vpop.f32.mrb[9].mxu0 }
 0x16d   : > { %v1877_v32 = vadd.f32 %v1876_v31, %v1875_v30  ;;  %v1878_v33 = vpop.f32.mrb[10].mxu0  ;;  %v2497_v30 = vcombine.high %v684_v28, %v684_v28  ;;  %v1779_v31 = vcombine.low %v684_v28, %v684_v28 }
 0x16e   : > { %v1879_v35 = vpop.f32.mrb[11].mxu0  ;;  %v665_v33 = vld [vmem:[%s2644_s3 + $0x28] sm:$0xff] }
 0x16f   : > { %v2413_v39 = vadd.f32 %v1877_v32, %v610_v29  ;;  %v2494_v29 = vcombine.low %v676_v24, %v680_v25  ;;  %v661_v32 = vld [vmem:[%s2644_s3 + $0x8] sm:$0xff]  ;;  %v1190_v34 = vsel %vm860_vm0, %v1779_v31, 0 }
 0x170   : > { %v1758_v35 = vcombine.high %v661_v32, %v665_v33  ;;  %v1757_v38 = vcombine.low %v661_v32, %v665_v33 }
 0x171   : > { %v2417_v40 = vpack.c.bf16 %v2413_v39, %v2413_v39 }
 0x173   : > { %1748 = vmatmul.mubr.msk.bf16.vlgmr.msra.gmra.mrb[0].mxu1 %vm856_vm1, %v2417_v40  ;;  %1752 = vmatmul.mubr.msk.bf16.vlgmr.msra.gmra.mrb[12].mxu0 %vm856_vm1, %v2417_v40  ;;  %v657_v10 = vunpack.c.l.bf16 %v2417_v40 }
 0x174   : > { %927 = vmatpush1.bf16.msra.mxu1 %v1717_v15  ;;  %1296 = vmatpush1.bf16.msra.mxu0 %v2400_v16 }
 0x175   : > { %928 = vmatprep.subr.bf16.mxu1 %v1726_v41  ;;  %1297 = vmatprep.subr.bf16.mxu0 %v1768_v42  ;;  %v658_v15 = vsub.f32 %v2413_v39, %v657_v10  ;;  %v1766_v39 = vcombine.high %v669_v36, %v673_v37  ;;  %v677_v41 = vld [vmem:[%s2644_s3 + $0x88] sm:$0xff] }
 0x176   : > { %958 = vmatprep.mubr.bf16.mxu1 %v2149_v18  ;;  %1327 = vmatprep.mubr.bf16.mxu0 %v2149_v18 }
 0x177   : > { %v2468_v22 = vpack.c.bf16 %v658_v15, %v658_v15 }
 0x178   : > { %929 = vmatpush1.bf16.msra.mxu1 %v1725_v47  ;;  %1298 = vmatpush1.bf16.msra.mxu0 %v1767_v48  ;;  %v1782_v47 = vcombine.high %v685_v45, %v685_v45 }
 0x179   : > { %930 = vmatprep.subr.bf16.mxu1 %v1734_v49  ;;  %1299 = vmatprep.subr.bf16.mxu0 %v1776_v50  ;;  %v663_v49 = vld [vmem:[%s2644_s3 + $0x18] sm:$0xff] }
 0x17c   : > { %931 = vmatpush1.bf16.msra.mxu1 %v1733_v53  ;;  %1300 = vmatpush1.bf16.msra.mxu0 %v1775_v54  ;;  %v671_v53 = vld [vmem:[%s2644_s3 + $0x58] sm:$0xff] }
 0x17d   : > { %1749 = vmatprep.subr.msk.bf16.mxu1 %vm860_vm0, %v1742_v55  ;;  %1791 = vmatprep.subr.msk.bf16.mxu0 %vm860_vm0, %v1784_v56 }
 0x180   : > { %933 = vmatpush1.bf16.msra.mxu1 %v868_v61  ;;  %1302 = vmatpush1.bf16.msra.mxu0 %v1202_v62  ;;  %v687_v61 = vld [vmem:[%s2644_s3 + $0xd8] sm:$0xff] }
 0x181   : > { %1008 = vmatprep.subr.bf16.mxu1 %v1722_v63  ;;  %1462 = vmatprep.subr.bf16.mxu0 %v2402_v17  ;;  %v2458_v17 = vcombine.high %v660_v13, %v664_v14  ;;  %v1786_v63 = vcombine.high %v687_v61, %v687_v61  ;;  %v1785_v0 = vcombine.low %v687_v61, %v687_v61 }
 0x183   : > { %1750 = vmatmul.mubr.msk.bf16.vlgmr.msra.gmra.mrb[4].mxu1 %vm856_vm1, %v2417_v40  ;;  %1792 = vmatmul.mubr.msk.bf16.vlgmr.msra.gmra.mrb[12].mxu0 %vm856_vm1, %v2417_v40  ;;  %v1208_v1 = vsel %vm860_vm0, %v1785_v0, 0 }
 0x184   : > { %1009 = vmatpush1.bf16.msra.mxu1 %v1721_v2  ;;  %1463 = vmatpush1.bf16.msra.mxu0 %v2400_v16  ;;  %v880_v16 = vsel %vm860_vm0, %v1745_v12, 0 }
 0x185   : > { %1010 = vmatprep.subr.bf16.mxu1 %v1730_v3  ;;  %1464 = vmatprep.subr.bf16.mxu0 %v1768_v42  ;;  %v681_v42 = vld [vmem:[%s2644_s3 + $0xa8] sm:$0xff] }
 0x186   : > { %1040 = vmatprep.mubr.bf16.mxu1 %v2149_v18  ;;  %1494 = vmatprep.mubr.bf16.mxu0 %v2149_v18  ;;  %v1774_v44 = vcombine.high %v677_v41, %v681_v42  ;;  %v1773_v46 = vcombine.low %v677_v41, %v681_v42 }
 0x188   : > { %1011 = vmatpush1.bf16.msra.mxu1 %v1729_v6  ;;  %1465 = vmatpush1.bf16.msra.mxu0 %v1767_v48  ;;  %v1781_v48 = vcombine.low %v685_v45, %v685_v45 }
 0x189   : > { %1012 = vmatprep.subr.bf16.mxu1 %v1738_v7  ;;  %1466 = vmatprep.subr.bf16.mxu0 %v1776_v50  ;;  %v667_v50 = vld [vmem:[%s2644_s3 + $0x38] sm:$0xff] }
 0x18a   : > { %v1196_v51 = vsel %vm860_vm0, %v1781_v48, 0  ;;  %v1762_v52 = vcombine.high %v663_v49, %v667_v50  ;;  %v1761_v55 = vcombine.low %v663_v49, %v667_v50 }
 0x18c   : > { %1013 = vmatpush1.bf16.msra.mxu1 %v1737_v9  ;;  %1467 = vmatpush1.bf16.msra.mxu0 %v1775_v54  ;;  %v675_v54 = vld [vmem:[%s2644_s3 + $0x78] sm:$0xff] }
 0x18d   : > { %1753 = vmatprep.subr.msk.bf16.mxu1 %vm860_vm0, %v1746_v11  ;;  %1799 = vmatprep.subr.msk.bf16.mxu0 %vm860_vm0, %v1784_v56  ;;  %v1770_v56 = vcombine.high %v671_v53, %v675_v54  ;;  %v1769_v59 = vcombine.low %v671_v53, %v675_v54 }
 0x190   : > { %1015 = vmatpush1.bf16.msra.mxu1 %v880_v16  ;;  %1469 = vmatpush1.bf16.msra.mxu0 %v1202_v62  ;;  %v1777_v62 = vcombine.low %v679_v57, %v683_v58 }
 0x191   : > { %1213 = vmatprep.subr.bf16.mxu1 %v2458_v17 }
 0x193   : > { %1754 = vmatmul.mubr.msk.bf16.vlgmr.msra.gmra.mrb[8].mxu1 %vm856_vm1, %v2417_v40  ;;  %1800 = vmatmul.mubr.msk.bf16.vlgmr.msra.gmra.mrb[12].mxu0 %vm856_vm1, %v2468_v22 }
 0x194   : > { %1214 = vmatpush1.bf16.msra.mxu1 %v2466_v21  ;;  %1245 = vmatprep.mubr.bf16.mxu1 %v2149_v18 }
 0x195   : > { %1215 = vmatprep.subr.bf16.mxu1 %v2471_v23 }
 0x198   : > { %1216 = vmatpush1.bf16.msra.mxu1 %v2484_v26 }
 0x199   : > { %1217 = vmatprep.subr.bf16.mxu1 %v2488_v27 }
 0x19c   : > { %1218 = vmatpush1.bf16.msra.mxu1 %v2494_v29 }
 0x19d   : > { %1787 = vmatprep.subr.msk.bf16.mxu1 %vm860_vm0, %v2497_v30 }
 0x1a0   : > { %1220 = vmatpush1.bf16.msra.mxu1 %v1190_v34 }
 0x1a1   : > { %1254 = vmatprep.subr.bf16.mxu1 %v1758_v35 }
 0x1a3   : > { %1788 = vmatmul.mubr.msk.bf16.vlgmr.msra.gmra.mrb[0].mxu1 %vm856_vm1, %v2417_v40 }
 0x1a4   : > { %1255 = vmatpush1.bf16.msra.mxu1 %v1757_v38  ;;  %1286 = vmatprep.mubr.bf16.mxu1 %v2149_v18 }
 0x1a5   : > { %1256 = vmatprep.subr.bf16.mxu1 %v1766_v39 }
 0x1a8   : > { %1257 = vmatpush1.bf16.msra.mxu1 %v1765_v43 }
 0x1a9   : > { %1258 = vmatprep.subr.bf16.mxu1 %v1774_v44 }
 0x1ac   : > { %1259 = vmatpush1.bf16.msra.mxu1 %v1773_v46 }
 0x1ad   : > { %1789 = vmatprep.subr.msk.bf16.mxu1 %vm860_vm0, %v1782_v47 }
 0x1b0   : > { %1261 = vmatpush1.bf16.msra.mxu1 %v1196_v51 }
 0x1b1   : > { %1336 = vmatprep.subr.bf16.mxu1 %v1762_v52 }
 0x1b3   : > { %1790 = vmatmul.mubr.msk.bf16.vlgmr.msra.gmra.mrb[4].mxu1 %vm856_vm1, %v2417_v40 }
 0x1b4   : > { %1337 = vmatpush1.bf16.msra.mxu1 %v1761_v55  ;;  %1368 = vmatprep.mubr.bf16.mxu1 %v2149_v18 }
 0x1b5   : > { %1338 = vmatprep.subr.bf16.mxu1 %v1770_v56 }
 0x1b8   : > { %1339 = vmatpush1.bf16.msra.mxu1 %v1769_v59 }
 0x1b9   : > { %1340 = vmatprep.subr.bf16.mxu1 %v1778_v60 }
 0x1bc   : > { %1341 = vmatpush1.bf16.msra.mxu1 %v1777_v62 }
 0x1bd   : > { %1793 = vmatprep.subr.msk.bf16.mxu1 %vm860_vm0, %v1786_v63 }
 0x1c0   : > { %1343 = vmatpush1.bf16.msra.mxu1 %v1208_v1 }
 0x1c1   : > { %1380 = vmatprep.subr.bf16.mxu1 %v2458_v17 }
 0x1c3   : > { %1794 = vmatmul.mubr.msk.bf16.vlgmr.msra.gmra.mrb[8].mxu1 %vm856_vm1, %v2417_v40 }
 0x1c4   : > { %1381 = vmatpush1.bf16.msra.mxu1 %v2466_v21  ;;  %1412 = vmatprep.mubr.bf16.mxu1 %v2149_v18 }
 0x1c5   : > { %1382 = vmatprep.subr.bf16.mxu1 %v2471_v23 }
 0x1c8   : > { %1383 = vmatpush1.bf16.msra.mxu1 %v2484_v26 }
 0x1c9   : > { %1384 = vmatprep.subr.bf16.mxu1 %v2488_v27 }
 0x1cc   : > { %1385 = vmatpush1.bf16.msra.mxu1 %v2494_v29 }
 0x1cd   : > { %1795 = vmatprep.subr.msk.bf16.mxu1 %vm860_vm0, %v2497_v30 }
 0x1d0   : > { %1387 = vmatpush1.bf16.msra.mxu1 %v1190_v34 }
 0x1d1   : > { %1421 = vmatprep.subr.bf16.mxu1 %v1758_v35 }
 0x1d3   : > { %1796 = vmatmul.mubr.msk.bf16.vlgmr.msra.gmra.mrb[0].mxu1 %vm856_vm1, %v2468_v22 }
 0x1d4   : > { %1422 = vmatpush1.bf16.msra.mxu1 %v1757_v38  ;;  %1453 = vmatprep.mubr.bf16.mxu1 %v2149_v18 }
 0x1d5   : > { %1423 = vmatprep.subr.bf16.mxu1 %v1766_v39 }
 0x1d8   : > { %1424 = vmatpush1.bf16.msra.mxu1 %v1765_v43 }
 0x1d9   : > { %1425 = vmatprep.subr.bf16.mxu1 %v1774_v44 }
 0x1dc   : > { %1426 = vmatpush1.bf16.msra.mxu1 %v1773_v46 }
 0x1dd   : > { %1797 = vmatprep.subr.msk.bf16.mxu1 %vm860_vm0, %v1782_v47 }
 0x1e0   : > { %1428 = vmatpush1.bf16.msra.mxu1 %v1196_v51 }
 0x1e1   : > { %1503 = vmatprep.subr.bf16.mxu1 %v1762_v52 }
 0x1e3   : > { %1798 = vmatmul.mubr.msk.bf16.vlgmr.msra.gmra.mrb[4].mxu1 %vm856_vm1, %v2468_v22 }
 0x1e4   : > { %1504 = vmatpush1.bf16.msra.mxu1 %v1761_v55  ;;  %1535 = vmatprep.mubr.bf16.mxu1 %v2149_v18 }
 0x1e5   : > { %1505 = vmatprep.subr.bf16.mxu1 %v1770_v56 }
 0x1e8   : > { %1506 = vmatpush1.bf16.msra.mxu1 %v1769_v59 }
 0x1e9   : > { %1507 = vmatprep.subr.bf16.mxu1 %v1778_v60 }
 0x1ec   : > { %1508 = vmatpush1.bf16.msra.mxu1 %v1777_v62 }
 0x1ed   : > { %1801 = vmatprep.subr.msk.bf16.mxu1 %vm860_vm0, %v1786_v63 }
 0x1f0   : > { %1510 = vmatpush1.bf16.msra.mxu1 %v1208_v1 }
 0x1f3   : > { %1802 = vmatmul.mubr.msk.bf16.vlgmr.msra.gmra.mrb[8].mxu1 %vm856_vm1, %v2468_v22 }
 0x266   : > { %v1496_v40 = vpop.f32.mrb[12].mxu0 }
 0x267   : > { %1807 = vst [vmem:[%s2319_s12 + $0x30] sm:$0xff] %v1496_v40  ;;  %v1498_v2 = vpop.f32.mrb[13].mxu0 }
 0x268   : > { %1808 = vst [vmem:[%s2319_s12 + $0x38] sm:$0xff] %v1498_v2  ;;  %v1500_v18 = vpop.f32.mrb[14].mxu0 }
 0x269   : > { %v1501_v3 = vpop.f32.mrb[15].mxu0 }
 0x2a6   : > { %v1414_v4 = vpop.f32.mrb[0].mxu1 }
 0x2a7   : > { %1803 = vst [vmem:[%s2319_s12 + $0x10] sm:$0xff] %v1414_v4  ;;  %v1416_v5 = vpop.f32.mrb[1].mxu1 }
 0x2a8   : > { %1804 = vst [vmem:[%s2319_s12 + $0x18] sm:$0xff] %v1416_v5  ;;  %v1418_v6 = vpop.f32.mrb[2].mxu1 }
 0x2a9   : > { %v1419_v7 = vpop.f32.mrb[3].mxu1 }
 0x2b6   : > { %v1455_v8 = vpop.f32.mrb[4].mxu1 }
 0x2b7   : > { %1805 = vst [vmem:[%s2319_s12 + $0x20] sm:$0xff] %v1455_v8  ;;  %v1457_v9 = vpop.f32.mrb[5].mxu1 }
 0x2b8   : > { %1806 = vst [vmem:[%s2319_s12 + $0x28] sm:$0xff] %v1457_v9  ;;  %v1459_v10 = vpop.f32.mrb[6].mxu1 }
 0x2b9   : > { %v1460_v11 = vpop.f32.mrb[7].mxu1 }
 0x2c6   : > { %v1537_v12 = vpop.f32.mrb[8].mxu1 }
 0x2c7   : > { %1809 = vst [vmem:[%s2319_s12 + $0x40] sm:$0xff] %v1537_v12  ;;  %v1539_v13 = vpop.f32.mrb[9].mxu1 }
 0x2c8   : > { %1810 = vst [vmem:[%s2319_s12 + $0x48] sm:$0xff] %v1539_v13  ;;  %v1541_v14 = vpop.f32.mrb[10].mxu1 }
 0x2c9   : > { %v1542_v15 = vpop.f32.mrb[11].mxu1 }
 0x2ca   : > { %2075 = shalt.err (!%p2072_p6)
}
 0x2cb   : > { %s2076_s13 = scalar_lea.hbm %s2587_s25, 1280  ;;  %s2080_s10 = scalar_lea.hbm %s2646_s5, 2560 }
 0x2cc   : > { %p2077_p7 = scmp.ne.s32.totalorder %s2587_s25, %s2076_s13  ;;  %p2081_p0 = scmp.lt.u32.totalorder %s2587_s25, %s2646_s5 }
 0x2cd   : > { %p2082_p2 = scmp.lt.u32.totalorder %s2080_s10, %s2076_s13  ;;  %p2084_p8 = scmp.lt.u32.totalorder %s2076_s13, %s2587_s25 }
 0x2ce   : > { %p2078_p9 = pnand %p2077_p7, %p2658_p10 }
 0x2cf   : > { %p2083_p4 = por %p2082_p2, %p2081_p0 }
 0x2d0   : > { %p2079_p12 = pneg %p2078_p9 }
 0x2d1   : > { %p2085_p11 = por %p2084_p8, %p2083_p4 }
 0x2d3   : > { %p2086_p13 = pnand %p2085_p11, %p2079_p12 }
 0x2d5   : > { %2089 = shalt.err (!%p2086_p13)
}
 0x2d6   : > { %s2151_s17 = smov 256   ;;  %s2152_s27 = smov 16  }
 0x2d7   : > { %1919 = dma.vmem_to_hbm [thread:$0]  (%p2658_p10), %s2589_s24, 1280, %s2587_s25, %s2595_s9, %s2151_s17, %s2151_s17, %s2152_s27  }
 0x2d8 PF: > { %p1931_p1 = scmp.ge.s32.totalorder %s2144_s23, 2  ;;  %s1595_s29 = sand.u32 1, %s2124_s18  }
 0x2d9   : > { %p2659_p3 = scmp.ne.s32.totalorder %s2652_s30, 0  ;;  %s1596_s21 = scalar_lea.sflag [#allocation4], %s1595_s29 }
 0x2db   : > { %p1926_p5 = pnand %p1931_p1, %p2659_p3 }
 0x2dd   : > { %2119 = dma.done.wait (!%p1926_p5), %s1596_s21, 1280  }
 0x2de   : > { %2121 = vsyncadd (!%p1926_p5), %s1596_s21, 4294966016  ;;  %s19_s23 = sadd.s32 1, %s2144_s23   ;;  %s2660_s18 = smov %s2128_s19 }
 0x2df   : > { %p16_p6 = scmp.ge.s32.totalorder %s19_s23, 4   ;;  %s2661_s19 = smov %s2132_s20 }
 0x2e0   : > { %s2662_s20 = smov %s2236_s6  ;;  %s2663_s21 = smov %s2140_s22 }
 0x2e1   : > { %s2664_s22 = smov %s2666_s26  ;;  %18 = sbr.rel (!%p16_p6) target bundleno = 5 (0x5), region = 84 }
 0x2e8   :  { %1601 = vsyncpa [#allocation3], 1 }
 0x2e9   :  { %1603 = vsyncpa [#allocation3 + $0x1], 1 }
 0x2ea   :  { %1604 = vsyncpa [#allocation4], 1 }
 0x2eb   :  { %1606 = vsyncpa [#allocation4 + $0x1], 1 }

</bundles_post_ra>
